<compile_context>
chip_gen: v5e
topology: v5e:2x2
jax: 0.10.0
libtpu: 0.0.40
codegen_flags: <defaults>
</compile_context>

<pallas_src>
import functools
import math

import jax
import jax.numpy as jnp
from jax.experimental import pallas as pl
from jax.experimental.pallas import tpu as pltpu


def encoder_block_kernel(
    x_ref,             # (S, D)   full-sequence activations for this batch element
    wq_ref, bq_ref,    # (D, D), (1, D)   Q projection (1/sqrt(hd) folded in)
    wk_ref, bk_ref,    # (D, D), (1, D)
    wv_ref, bv_ref,    # (D, D), (1, D)
    wo_ref, bo_ref,    # (D, D), (1, D)
    g1_ref, be1_ref,   # (1, D) LayerNorm1 gamma / beta
    w1_ref, b1_ref,    # (D, F), (1, F)
    w2_ref, b2_ref,    # (F, D), (1, D)
    g2_ref, be2_ref,   # (1, D) LayerNorm2 gamma / beta
    o_ref,             # (tm, D)
    k_sc, v_sc,        # (H, S, hd) VMEM scratch: K/V of the current batch element
    *,
    num_heads,
    head_dim,
    q_tile,
    kv_tile,
):
    f32 = jnp.float32
    cdt = wq_ref.dtype            # MXU compute dtype (bf16 or f32); accumulation is f32
    eps = 1e-5
    H, hd = num_heads, head_dim
    tm, tkv = q_tile, kv_tile
    S = x_ref.shape[0]
    qt = pl.program_id(1)

    def split_heads(t):           # (n, D) -> (H, n, hd): static lane slices + major stack
        return jnp.stack([t[:, h * hd:(h + 1) * hd] for h in range(H)], axis=0)

    # ---------------- K/V projections: once per batch element (qt == 0) ---------------
    # Scratch persists across grid steps; the query-tile grid axis is "arbitrary" so the
    # K/V for this batch element are reused by every query tile instead of recomputed.
    @pl.when(qt == 0)
    def _():
        xkv = x_ref[...].astype(cdt)                                       # (S, D)
        k2 = jnp.dot(xkv, wk_ref[...], preferred_element_type=f32) + bk_ref[...].astype(f32)
        v2 = jnp.dot(xkv, wv_ref[...], preferred_element_type=f32) + bv_ref[...].astype(f32)
        k_sc[...] = split_heads(k2).astype(cdt)                            # (H, S, hd)
        v_sc[...] = split_heads(v2).astype(cdt)

    # ---------------- Query tile: sliced from the resident full-sequence block --------
    q_start = pl.multiple_of(qt * tm, tm)
    xq = x_ref[pl.ds(q_start, tm), :]                                      # (tm, D)
    xq_f32 = xq.astype(f32)

    q2 = jnp.dot(xq.astype(cdt), wq_ref[...], preferred_element_type=f32) + bq_ref[...].astype(f32)
    qh = split_heads(q2).astype(cdt)                                       # (H, tm, hd)

    # ---------------- Flash-style attention: online softmax over KV tiles -------------
    n_kv = S // tkv

    def kv_step(i, carry):
        m, l, acc = carry
        s0 = pl.multiple_of(i * tkv, tkv)
        kc = k_sc[:, pl.ds(s0, tkv), :]                                    # (H, tkv, hd)
        vc = v_sc[:, pl.ds(s0, tkv), :]
        s = jnp.einsum("hqd,hkd->hqk", qh, kc, preferred_element_type=f32)  # (H, tm, tkv)
        m_new = jnp.maximum(m, jnp.max(s, axis=-1, keepdims=True))
        alpha = jnp.exp(m - m_new)
        p = jnp.exp(s - m_new)
        l = alpha * l + jnp.sum(p, axis=-1, keepdims=True)
        acc = alpha * acc + jnp.einsum("hqk,hkd->hqd", p.astype(cdt), vc,
                                       preferred_element_type=f32)
        return m_new, l, acc

    carry0 = (jnp.full((H, tm, 1), -jnp.inf, f32),
              jnp.zeros((H, tm, 1), f32),
              jnp.zeros((H, tm, hd), f32))
    m_i, l_i, acc = jax.lax.fori_loop(0, n_kv, kv_step, carry0, unroll=(n_kv <= 4))

    # EUP approximate reciprocal on the low-precision path; exact on the f32 path.
    inv = pl.reciprocal(l_i, approx=bool(cdt != jnp.float32))
    ctx = (acc * inv).astype(cdt)                                          # (H, tm, hd)

    # ---------------- Heads -> lanes (PyTorch reshape order) + single O matmul --------
    ctx_flat = jnp.concatenate([ctx[h] for h in range(H)], axis=-1)        # (tm, D)
    attn_out = jnp.dot(ctx_flat, wo_ref[...], preferred_element_type=f32) + bo_ref[...].astype(f32)

    # ---------------- Residual + LayerNorm 1 (f32 statistics) -------------------------
    x1 = xq_f32 + attn_out
    mu1 = jnp.mean(x1, axis=-1, keepdims=True)
    var1 = jnp.mean(jnp.square(x1 - mu1), axis=-1, keepdims=True)
    x1n = (x1 - mu1) * jax.lax.rsqrt(var1 + eps) * g1_ref[...].astype(f32) + be1_ref[...].astype(f32)

    # ---------------- Feed-forward: Linear -> SiLU -> Linear ---------------------------
    h1 = jnp.dot(x1n.astype(cdt), w1_ref[...], preferred_element_type=f32) + b1_ref[...].astype(f32)
    h1 = h1 * jax.nn.sigmoid(h1)                                           # SiLU in f32
    ff = jnp.dot(h1.astype(cdt), w2_ref[...], preferred_element_type=f32) + b2_ref[...].astype(f32)

    # ---------------- Residual + LayerNorm 2 -------------------------------------------
    x2 = x1n + ff
    mu2 = jnp.mean(x2, axis=-1, keepdims=True)
    var2 = jnp.mean(jnp.square(x2 - mu2), axis=-1, keepdims=True)
    x2n = (x2 - mu2) * jax.lax.rsqrt(var2 + eps) * g2_ref[...].astype(f32) + be2_ref[...].astype(f32)

    o_ref[...] = x2n.astype(o_ref.dtype)


def encoder_block(x, params, *, num_heads, compute_dtype=jnp.bfloat16):
    B, S, D = x.shape
    F_dim = params["w1"].shape[1]
    assert D % num_heads == 0
    H = num_heads
    hd = D // H
    cdt = jnp.dtype(compute_dtype)
    out_dtype = x.dtype
    scale = 1.0 / math.sqrt(hd)

    # ---- Host-side re-pack: per-head interleaved [q|k|v] columns -> full-width Q/K/V
    #      slabs; the softmax scale is folded into the Q projection (free on the MXU).
    wqkv = params["wqkv"].reshape(D, H, 3, hd)
    bqkv = params["bqkv"].reshape(1, H, 3, hd)
    wq = (wqkv[:, :, 0, :].reshape(D, D) * scale).astype(cdt)
    wk = wqkv[:, :, 1, :].reshape(D, D).astype(cdt)
    wv = wqkv[:, :, 2, :].reshape(D, D).astype(cdt)
    bq = (bqkv[:, :, 0, :].reshape(1, D) * scale).astype(jnp.float32)
    bk = bqkv[:, :, 1, :].reshape(1, D).astype(jnp.float32)
    bv = bqkv[:, :, 2, :].reshape(1, D).astype(jnp.float32)
    wo = params["wo"].astype(cdt)
    bo = params["bo"].astype(jnp.float32)
    g1 = params["ln1_g"].astype(jnp.float32)
    be1 = params["ln1_b"].astype(jnp.float32)
    w1 = params["w1"].astype(cdt)
    b1 = params["b1"].astype(jnp.float32)
    w2 = params["w2"].astype(cdt)
    b2 = params["b2"].astype(jnp.float32)
    g2 = params["ln2_g"].astype(jnp.float32)
    be2 = params["ln2_b"].astype(jnp.float32)

    # Activation stream in the MXU dtype: halves the (S, D) DMA / VMEM block on bf16.
    x_in = x.astype(cdt) if cdt == jnp.bfloat16 else x

    # ---- Tile sizes: tm matches the 256-wide v6e/v7x MXU when possible; tkv bounds the
    #      per-step (H, tm, tkv) logits for the online-softmax loop.
    if S % 256 == 0:
        tm = 256
    elif S % 128 == 0:
        tm = 128
    else:
        tm = S
    tkv = S
    for cand in (512, 256, 128):
        if S % cand == 0:
            tkv = cand
            break
    n_qt = S // tm

    kernel = functools.partial(encoder_block_kernel, num_heads=H, head_dim=hd,
                               q_tile=tm, kv_tile=tkv)

    weight_args = [wq, bq, wk, bk, wv, bv, wo, bo, g1, be1, w1, b1, w2, b2, g2, be2]
    weight_bytes = sum(int(a.size) * a.dtype.itemsize for a in weight_args)
    cbytes = jnp.dtype(cdt).itemsize
    xbytes = jnp.dtype(x_in.dtype).itemsize
    obytes = jnp.dtype(out_dtype).itemsize

    # ---- Honest cost estimate (K/V projected once per batch element; x read once). ---
    flops = int(2 * B * S * D * 3 * D          # QKV projections
                + 2 * B * S * D * D            # output projection
                + 4 * B * S * S * D            # attention logits + context
                + 4 * B * S * D * F_dim)       # FFN
    transcendentals = int(B * H * S * S + B * S * F_dim + 4 * B * S)
    bytes_accessed = int(B * S * D * xbytes + B * S * D * obytes + weight_bytes)
    cost = pl.CostEstimate(flops=flops, transcendentals=transcendentals,
                           bytes_accessed=bytes_accessed)

    def _build_specs(single_buffer_weights):
        if single_buffer_weights:
            # Constant index_map -> the second pipeline buffer is never used for overlap;
            # single-buffer the resident weights to reclaim VMEM (matters on v7x 64 MiB).
            def _rep(shape):
                nd = len(shape)
                return pl.BlockSpec(shape, lambda b, i, _nd=nd: (0,) * _nd,
                                    pipeline_mode=pl.Buffered(1))
        else:
            def _rep(shape):
                nd = len(shape)
                return pl.BlockSpec(shape, lambda b, i, _nd=nd: (0,) * _nd)

        in_specs = [
            pl.BlockSpec((None, S, D), lambda b, i: (b, 0, 0)),   # x: full sequence / batch
            _rep((D, D)), _rep((1, D)),          # wq, bq
            _rep((D, D)), _rep((1, D)),          # wk, bk
            _rep((D, D)), _rep((1, D)),          # wv, bv
            _rep((D, D)), _rep((1, D)),          # wo, bo
            _rep((1, D)), _rep((1, D)),          # ln1 gamma, beta
            _rep((D, F_dim)), _rep((1, F_dim)),  # w1, b1
            _rep((F_dim, D)), _rep((1, D)),      # w2, b2
            _rep((1, D)), _rep((1, D)),          # ln2 gamma, beta
        ]
        out_spec = pl.BlockSpec((None, tm, D), lambda b, i: (b, i, 0))

        # ---- Re-derived VMEM budget for the new structure. ----
        wbuf = 1 if single_buffer_weights else 2
        block_bytes = 2 * S * D * xbytes + 2 * tm * D * obytes     # x + out double buffers
        scratch_bytes = 2 * H * S * hd * cbytes                    # K/V scratch
        inter_bytes = 4 * (2 * S * D                               # k2/v2 (f32, init step)
                           + 3 * tm * D                            # q2 / x1 / x1n
                           + 2 * H * tm * tkv                      # logits + p (per KV tile)
                           + 3 * H * tm * hd                       # acc / ctx
                           + tm * F_dim                            # h1
                           + 4 * tm * D)                           # ff / x2 / temporaries
        needed = wbuf * weight_bytes + block_bytes + scratch_bytes + inter_bytes
        try:
            phys_vmem = int(pltpu.get_tpu_info().vmem_capacity_bytes)
        except Exception:
            phys_vmem = 64 * 1024 * 1024
        vmem_limit = min(int(phys_vmem * 0.9),
                         max(int(needed * 1.3) + (2 << 20), 32 << 20))
        return in_specs, out_spec, int(vmem_limit)

    def _run(single_buffer_weights):
        in_specs, out_spec, vmem_limit = _build_specs(single_buffer_weights)
        return pl.pallas_call(
            kernel,
            out_shape=jax.ShapeDtypeStruct((B, S, D), out_dtype),
            grid=(B, n_qt),
            in_specs=in_specs,
            out_specs=out_spec,
            scratch_shapes=[pltpu.VMEM((H, S, hd), cdt),    # K scratch (per batch element)
                            pltpu.VMEM((H, S, hd), cdt)],   # V scratch
            compiler_params=pltpu.CompilerParams(
                # qt axis is "arbitrary": K/V scratch is carried across query tiles.
                dimension_semantics=("parallel", "arbitrary"),
                vmem_limit_bytes=vmem_limit),
            cost_estimate=cost,
        )(x_in, wq, bq, wk, bk, wv, bv, wo, bo, g1, be1, w1, b1, w2, b2, g2, be2)

    try:
        return _run(True)
    except Exception:
        # Fallback if this JAX build rejects single-buffered (pl.Buffered(1)) specs.
        return _run(False)


def init_params(key, input_dim, num_heads, dim_feedforward):
    """Deterministic parameter init matching the PyTorch module's shapes.

    qkv/o projection weights use Xavier-uniform, biases zero; FFN linears use the same
    init; LayerNorm gamma=1, beta=0.  Stored as (in, out) so y = x @ W + b.
    """
    D, F = input_dim, dim_feedforward
    k = jax.random.split(key, 4)

    def xavier(k_, fan_in, fan_out):
        bound = math.sqrt(6.0 / (fan_in + fan_out))
        return jax.random.uniform(k_, (fan_in, fan_out), jnp.float32,
                                  minval=-bound, maxval=bound)

    return {
        "wqkv": xavier(k[0], D, 3 * D),
        "bqkv": jnp.zeros((1, 3 * D), jnp.float32),
        "wo":   xavier(k[1], D, D),
        "bo":   jnp.zeros((1, D), jnp.float32),
        "ln1_g": jnp.ones((1, D), jnp.float32),
        "ln1_b": jnp.zeros((1, D), jnp.float32),
        "w1":   xavier(k[2], D, F),
        "b1":   jnp.zeros((1, F), jnp.float32),
        "w2":   xavier(k[3], F, D),
        "b2":   jnp.zeros((1, D), jnp.float32),
        "ln2_g": jnp.ones((1, D), jnp.float32),
        "ln2_b": jnp.zeros((1, D), jnp.float32),
    }


def encoder_block_ref(x, params, *, num_heads):
    """Pure-JAX reference implementing the PyTorch forward exactly (original layout)."""
    B, S, D = x.shape
    hd = D // num_heads
    eps = 1e-5

    qkv = x @ params["wqkv"] + params["bqkv"]                       # (B, S, 3D)
    qkv = qkv.reshape(B, S, num_heads, 3 * hd).transpose(0, 2, 1, 3)
    q, k, v = jnp.split(qkv, 3, axis=-1)
    logits = jnp.einsum("bhqd,bhkd->bhqk", q, k) / math.sqrt(hd)
    attn = jax.nn.softmax(logits, axis=-1)
    vals = jnp.einsum("bhqk,bhkd->bhqd", attn, v)
    vals = vals.transpose(0, 2, 1, 3).reshape(B, S, D)
    attn_out = vals @ params["wo"] + params["bo"]

    x1 = x + attn_out
    mu = jnp.mean(x1, -1, keepdims=True)
    var = jnp.mean((x1 - mu) ** 2, -1, keepdims=True)
    x1n = (x1 - mu) / jnp.sqrt(var + eps) * params["ln1_g"] + params["ln1_b"]

    h = x1n @ params["w1"] + params["b1"]
    h = h * jax.nn.sigmoid(h)
    ff = h @ params["w2"] + params["b2"]

    x2 = x1n + ff
    mu2 = jnp.mean(x2, -1, keepdims=True)
    var2 = jnp.mean((x2 - mu2) ** 2, -1, keepdims=True)
    return (x2 - mu2) / jnp.sqrt(var2 + eps) * params["ln2_g"] + params["ln2_b"]


if __name__ == "__main__":
    B, S, D = 2, 8, 32
    NUM_HEADS = 4
    DIM_FF = 64

    key = jax.random.PRNGKey(0)
    kx, kp = jax.random.split(key)
    x = jax.random.normal(kx, (B, S, D), jnp.float32)
    params = init_params(kp, D, NUM_HEADS, DIM_FF)

    ref = encoder_block_ref(x, params, num_heads=NUM_HEADS)

    # f32 MXU path -- tight correctness check against the pure-JAX reference.
    out_f32 = jax.block_until_ready(
        encoder_block(x, params, num_heads=NUM_HEADS, compute_dtype=jnp.float32))
    assert out_f32.shape == (B, S, D)
    max_err = float(jnp.max(jnp.abs(out_f32 - ref)))
    assert jnp.allclose(out_f32, ref, atol=1e-3, rtol=1e-3), max_err

    # Default bf16 MXU path (f32 accumulation / statistics) -- loose check.
    out_bf16 = jax.block_until_ready(encoder_block(x, params, num_heads=NUM_HEADS))
    assert out_bf16.shape == (B, S, D)
    assert bool(jnp.all(jnp.isfinite(out_bf16)))
    assert float(jnp.mean(jnp.abs(out_bf16 - ref))) < 0.1

    print("KERNEL_OK")
</pallas_src>

<mosaic_0001>
module attributes {stable_mosaic.version = 11 : i64} {
  func.func @encoder_block_kernel(%arg0: i32, %arg1: i32, %arg2: memref<1x8x32xf32, #tpu.memory_space<vmem>>, %arg3: memref<32x32xf32, #tpu.memory_space<vmem>>, %arg4: memref<1x32xf32, #tpu.memory_space<vmem>>, %arg5: memref<32x32xf32, #tpu.memory_space<vmem>>, %arg6: memref<1x32xf32, #tpu.memory_space<vmem>>, %arg7: memref<32x32xf32, #tpu.memory_space<vmem>>, %arg8: memref<1x32xf32, #tpu.memory_space<vmem>>, %arg9: memref<32x32xf32, #tpu.memory_space<vmem>>, %arg10: memref<1x32xf32, #tpu.memory_space<vmem>>, %arg11: memref<1x32xf32, #tpu.memory_space<vmem>>, %arg12: memref<1x32xf32, #tpu.memory_space<vmem>>, %arg13: memref<32x64xf32, #tpu.memory_space<vmem>>, %arg14: memref<1x64xf32, #tpu.memory_space<vmem>>, %arg15: memref<64x32xf32, #tpu.memory_space<vmem>>, %arg16: memref<1x32xf32, #tpu.memory_space<vmem>>, %arg17: memref<1x32xf32, #tpu.memory_space<vmem>>, %arg18: memref<1x32xf32, #tpu.memory_space<vmem>>, %arg19: memref<1x8x32xf32, #tpu.memory_space<vmem>>, %arg20: memref<4x8x8xf32, #tpu.memory_space<vmem>>, %arg21: memref<4x8x8xf32, #tpu.memory_space<vmem>>) attributes {dimension_semantics = [#tpu.dimension_semantics<parallel>, #tpu.dimension_semantics<arbitrary>], iteration_bounds = array<i64: 2, 1>, scalar_prefetch = 0 : i64, scratch_operands = 2 : i64, tpu.core_type = #tpu.core_type<tc>, window_params = [{transform_indices = @transform_0, window_bounds = array<i64: 1, 8, 32>}, {pipeline_mode = #tpu.pipeline_mode<synchronous>, transform_indices = @transform_1, window_bounds = array<i64: 32, 32>}, {pipeline_mode = #tpu.pipeline_mode<synchronous>, transform_indices = @transform_2, window_bounds = array<i64: 1, 32>}, {pipeline_mode = #tpu.pipeline_mode<synchronous>, transform_indices = @transform_3, window_bounds = array<i64: 32, 32>}, {pipeline_mode = #tpu.pipeline_mode<synchronous>, transform_indices = @transform_4, window_bounds = array<i64: 1, 32>}, {pipeline_mode = #tpu.pipeline_mode<synchronous>, transform_indices = @transform_5, window_bounds = array<i64: 32, 32>}, {pipeline_mode = #tpu.pipeline_mode<synchronous>, transform_indices = @transform_6, window_bounds = array<i64: 1, 32>}, {pipeline_mode = #tpu.pipeline_mode<synchronous>, transform_indices = @transform_7, window_bounds = array<i64: 32, 32>}, {pipeline_mode = #tpu.pipeline_mode<synchronous>, transform_indices = @transform_8, window_bounds = array<i64: 1, 32>}, {pipeline_mode = #tpu.pipeline_mode<synchronous>, transform_indices = @transform_9, window_bounds = array<i64: 1, 32>}, {pipeline_mode = #tpu.pipeline_mode<synchronous>, transform_indices = @transform_10, window_bounds = array<i64: 1, 32>}, {pipeline_mode = #tpu.pipeline_mode<synchronous>, transform_indices = @transform_11, window_bounds = array<i64: 32, 64>}, {pipeline_mode = #tpu.pipeline_mode<synchronous>, transform_indices = @transform_12, window_bounds = array<i64: 1, 64>}, {pipeline_mode = #tpu.pipeline_mode<synchronous>, transform_indices = @transform_13, window_bounds = array<i64: 64, 32>}, {pipeline_mode = #tpu.pipeline_mode<synchronous>, transform_indices = @transform_14, window_bounds = array<i64: 1, 32>}, {pipeline_mode = #tpu.pipeline_mode<synchronous>, transform_indices = @transform_15, window_bounds = array<i64: 1, 32>}, {pipeline_mode = #tpu.pipeline_mode<synchronous>, transform_indices = @transform_16, window_bounds = array<i64: 1, 32>}, {transform_indices = @transform_17, window_bounds = array<i64: 1, 8, 32>}]} {
    %c0_i32 = arith.constant 0 : i32
    %0 = arith.cmpi eq, %arg1, %c0_i32 : i32
    %1 = arith.extui %0 : i1 to i32
    %c0_i32_0 = arith.constant 0 : i32
    %2 = arith.cmpi ne, %1, %c0_i32_0 : i32
    scf.if %2 {
      %c0_56 = arith.constant 0 : index
      %c0_57 = arith.constant 0 : index
      %c0_58 = arith.constant 0 : index
      %134 = vector.load %arg2[%c0_56, %c0_57, %c0_58] : memref<1x8x32xf32, #tpu.memory_space<vmem>>, vector<1x8x32xf32>
      %135 = vector.shape_cast %134 : vector<1x8x32xf32> to vector<8x32xf32>
      %c0_59 = arith.constant 0 : index
      %c0_60 = arith.constant 0 : index
      %136 = vector.load %arg5[%c0_59, %c0_60] : memref<32x32xf32, #tpu.memory_space<vmem>>, vector<32x32xf32>
      %cst_61 = arith.constant dense<0.000000e+00> : vector<8x32xf32>
      %137 = tpu.matmul %135, %136, %cst_61 {dimension_numbers = #tpu.dot_dimension_numbers<[1], [0], [0], [1], [0, 0, 1, 1], [], []>} : vector<8x32xf32>, vector<32x32xf32>, vector<8x32xf32> -> vector<8x32xf32>
      %c0_62 = arith.constant 0 : index
      %c0_63 = arith.constant 0 : index
      %138 = vector.load %arg6[%c0_62, %c0_63] : memref<1x32xf32, #tpu.memory_space<vmem>>, vector<1x32xf32>
      %139 = vector.broadcast %138 : vector<1x32xf32> to vector<8x32xf32>
      %140 = arith.addf %137, %139 : vector<8x32xf32>
      %c0_64 = arith.constant 0 : index
      %c0_65 = arith.constant 0 : index
      %141 = vector.load %arg7[%c0_64, %c0_65] : memref<32x32xf32, #tpu.memory_space<vmem>>, vector<32x32xf32>
      %cst_66 = arith.constant dense<0.000000e+00> : vector<8x32xf32>
      %142 = tpu.matmul %135, %141, %cst_66 {dimension_numbers = #tpu.dot_dimension_numbers<[1], [0], [0], [1], [0, 0, 1, 1], [], []>} : vector<8x32xf32>, vector<32x32xf32>, vector<8x32xf32> -> vector<8x32xf32>
      %c0_67 = arith.constant 0 : index
      %c0_68 = arith.constant 0 : index
      %143 = vector.load %arg8[%c0_67, %c0_68] : memref<1x32xf32, #tpu.memory_space<vmem>>, vector<1x32xf32>
      %144 = vector.broadcast %143 : vector<1x32xf32> to vector<8x32xf32>
      %145 = arith.addf %142, %144 : vector<8x32xf32>
      %146 = vector.extract_strided_slice %140 {offsets = [0, 0], sizes = [8, 8], strides = [1, 1]} : vector<8x32xf32> to vector<8x8xf32>
      %147 = vector.extract_strided_slice %140 {offsets = [0, 8], sizes = [8, 8], strides = [1, 1]} : vector<8x32xf32> to vector<8x8xf32>
      %148 = vector.extract_strided_slice %140 {offsets = [0, 16], sizes = [8, 8], strides = [1, 1]} : vector<8x32xf32> to vector<8x8xf32>
      %149 = vector.extract_strided_slice %140 {offsets = [0, 24], sizes = [8, 8], strides = [1, 1]} : vector<8x32xf32> to vector<8x8xf32>
      %150 = vector.shape_cast %146 : vector<8x8xf32> to vector<1x8x8xf32>
      %151 = vector.shape_cast %147 : vector<8x8xf32> to vector<1x8x8xf32>
      %152 = vector.shape_cast %148 : vector<8x8xf32> to vector<1x8x8xf32>
      %153 = vector.shape_cast %149 : vector<8x8xf32> to vector<1x8x8xf32>
      %154 = tpu.concatenate %150, %151, %152, %153 in 0 : vector<1x8x8xf32>, vector<1x8x8xf32>, vector<1x8x8xf32>, vector<1x8x8xf32> -> vector<4x8x8xf32>
      %c0_69 = arith.constant 0 : index
      %c0_70 = arith.constant 0 : index
      %c0_71 = arith.constant 0 : index
      %155 = vector.load %arg20[%c0_69, %c0_70, %c0_71] : memref<4x8x8xf32, #tpu.memory_space<vmem>>, vector<4x8x8xf32>
      tpu.vector_store %arg20[%c0_69, %c0_70, %c0_71], %154 {strides = array<i32>} : memref<4x8x8xf32, #tpu.memory_space<vmem>>, vector<4x8x8xf32>,
      %156 = vector.extract_strided_slice %145 {offsets = [0, 0], sizes = [8, 8], strides = [1, 1]} : vector<8x32xf32> to vector<8x8xf32>
      %157 = vector.extract_strided_slice %145 {offsets = [0, 8], sizes = [8, 8], strides = [1, 1]} : vector<8x32xf32> to vector<8x8xf32>
      %158 = vector.extract_strided_slice %145 {offsets = [0, 16], sizes = [8, 8], strides = [1, 1]} : vector<8x32xf32> to vector<8x8xf32>
      %159 = vector.extract_strided_slice %145 {offsets = [0, 24], sizes = [8, 8], strides = [1, 1]} : vector<8x32xf32> to vector<8x8xf32>
      %160 = vector.shape_cast %156 : vector<8x8xf32> to vector<1x8x8xf32>
      %161 = vector.shape_cast %157 : vector<8x8xf32> to vector<1x8x8xf32>
      %162 = vector.shape_cast %158 : vector<8x8xf32> to vector<1x8x8xf32>
      %163 = vector.shape_cast %159 : vector<8x8xf32> to vector<1x8x8xf32>
      %164 = tpu.concatenate %160, %161, %162, %163 in 0 : vector<1x8x8xf32>, vector<1x8x8xf32>, vector<1x8x8xf32>, vector<1x8x8xf32> -> vector<4x8x8xf32>
      %c0_72 = arith.constant 0 : index
      %c0_73 = arith.constant 0 : index
      %c0_74 = arith.constant 0 : index
      %165 = vector.load %arg21[%c0_72, %c0_73, %c0_74] : memref<4x8x8xf32, #tpu.memory_space<vmem>>, vector<4x8x8xf32>
      tpu.vector_store %arg21[%c0_72, %c0_73, %c0_74], %164 {strides = array<i32>} : memref<4x8x8xf32, #tpu.memory_space<vmem>>, vector<4x8x8xf32>,
    } else {
    }
    %c8_i32 = arith.constant 8 : i32
    %3 = arith.muli %arg1, %c8_i32 : i32
    %4 = tpu.assume_multiple %3, 8 : i32
    %c0 = arith.constant 0 : index
    %5 = arith.index_cast %4 : i32 to index
    %c0_1 = arith.constant 0 : index
    %6 = vector.load %arg2[%c0, %5, %c0_1] : memref<1x8x32xf32, #tpu.memory_space<vmem>>, vector<1x8x32xf32>
    %7 = vector.shape_cast %6 : vector<1x8x32xf32> to vector<8x32xf32>
    %c0_2 = arith.constant 0 : index
    %c0_3 = arith.constant 0 : index
    %8 = vector.load %arg3[%c0_2, %c0_3] : memref<32x32xf32, #tpu.memory_space<vmem>>, vector<32x32xf32>
    %cst = arith.constant dense<0.000000e+00> : vector<8x32xf32>
    %9 = tpu.matmul %7, %8, %cst {dimension_numbers = #tpu.dot_dimension_numbers<[1], [0], [0], [1], [0, 0, 1, 1], [], []>} : vector<8x32xf32>, vector<32x32xf32>, vector<8x32xf32> -> vector<8x32xf32>
    %c0_4 = arith.constant 0 : index
    %c0_5 = arith.constant 0 : index
    %10 = vector.load %arg4[%c0_4, %c0_5] : memref<1x32xf32, #tpu.memory_space<vmem>>, vector<1x32xf32>
    %11 = vector.broadcast %10 : vector<1x32xf32> to vector<8x32xf32>
    %12 = arith.addf %9, %11 : vector<8x32xf32>
    %13 = vector.extract_strided_slice %12 {offsets = [0, 0], sizes = [8, 8], strides = [1, 1]} : vector<8x32xf32> to vector<8x8xf32>
    %14 = vector.extract_strided_slice %12 {offsets = [0, 8], sizes = [8, 8], strides = [1, 1]} : vector<8x32xf32> to vector<8x8xf32>
    %15 = vector.extract_strided_slice %12 {offsets = [0, 16], sizes = [8, 8], strides = [1, 1]} : vector<8x32xf32> to vector<8x8xf32>
    %16 = vector.extract_strided_slice %12 {offsets = [0, 24], sizes = [8, 8], strides = [1, 1]} : vector<8x32xf32> to vector<8x8xf32>
    %17 = vector.shape_cast %13 : vector<8x8xf32> to vector<1x8x8xf32>
    %18 = vector.shape_cast %14 : vector<8x8xf32> to vector<1x8x8xf32>
    %19 = vector.shape_cast %15 : vector<8x8xf32> to vector<1x8x8xf32>
    %20 = vector.shape_cast %16 : vector<8x8xf32> to vector<1x8x8xf32>
    %21 = tpu.concatenate %17, %18, %19, %20 in 0 : vector<1x8x8xf32>, vector<1x8x8xf32>, vector<1x8x8xf32>, vector<1x8x8xf32> -> vector<4x8x8xf32>
    %cst_6 = arith.constant 0xFF800000 : f32
    %22 = vector.broadcast %cst_6 : f32 to vector<4x8x1xf32>
    %cst_7 = arith.constant 0.000000e+00 : f32
    %23 = vector.broadcast %cst_7 : f32 to vector<4x8x1xf32>
    %cst_8 = arith.constant 0.000000e+00 : f32
    %24 = vector.broadcast %cst_8 : f32 to vector<4x8x8xf32>
    %c0_i32_9 = arith.constant 0 : i32
    %c8_i32_10 = arith.constant 8 : i32
    %25 = arith.muli %c0_i32_9, %c8_i32_10 : i32
    %26 = tpu.assume_multiple %25, 8 : i32
    %c0_11 = arith.constant 0 : index
    %27 = arith.index_cast %26 : i32 to index
    %c0_12 = arith.constant 0 : index
    %28 = vector.load %arg20[%c0_11, %27, %c0_12] : memref<4x8x8xf32, #tpu.memory_space<vmem>>, vector<4x8x8xf32>
    %c0_13 = arith.constant 0 : index
    %29 = arith.index_cast %26 : i32 to index
    %c0_14 = arith.constant 0 : index
    %30 = vector.load %arg21[%c0_13, %29, %c0_14] : memref<4x8x8xf32, #tpu.memory_space<vmem>>, vector<4x8x8xf32>
    "tpu.trace_start"() <{level = 10 : i32, message = "hqd,hkd->hqk"}> : () -> ()
    %cst_15 = arith.constant dense<0.000000e+00> : vector<4x8x8xf32>
    %31 = tpu.matmul %21, %28, %cst_15 {dimension_numbers = #tpu.dot_dimension_numbers<[2], [2], [1], [1], [0, 0, 0, 1, 1, 1], [0], [0]>} : vector<4x8x8xf32>, vector<4x8x8xf32>, vector<4x8x8xf32> -> vector<4x8x8xf32>
    "tpu.trace_stop"() : () -> ()
    %cst_16 = arith.constant dense<0xFF800000> : vector<4x8xf32>
    %32 = vector.multi_reduction <maximumf>, %31, %cst_16 [2] : vector<4x8x8xf32> to vector<4x8xf32>
    %33 = vector.shape_cast %32 : vector<4x8xf32> to vector<4x8x1xf32>
    %34 = arith.maximumf %22, %33 : vector<4x8x1xf32>
    %35 = arith.subf %22, %34 : vector<4x8x1xf32>
    %36 = math.exp %35 : vector<4x8x1xf32>
    %37 = vector.broadcast %34 : vector<4x8x1xf32> to vector<4x8x8xf32>
    %38 = arith.subf %31, %37 : vector<4x8x8xf32>
    %39 = math.exp %38 : vector<4x8x8xf32>
    %40 = arith.mulf %36, %23 : vector<4x8x1xf32>
    %cst_17 = arith.constant dense<0.000000e+00> : vector<4x8xf32>
    %41 = vector.multi_reduction <add>, %39, %cst_17 [2] : vector<4x8x8xf32> to vector<4x8xf32>
    %42 = vector.shape_cast %41 : vector<4x8xf32> to vector<4x8x1xf32>
    %43 = arith.addf %40, %42 : vector<4x8x1xf32>
    %44 = vector.broadcast %36 : vector<4x8x1xf32> to vector<4x8x8xf32>
    %45 = arith.mulf %44, %24 : vector<4x8x8xf32>
    "tpu.trace_start"() <{level = 10 : i32, message = "hqk,hkd->hqd"}> : () -> ()
    %cst_18 = arith.constant dense<0.000000e+00> : vector<4x8x8xf32>
    %46 = tpu.matmul %39, %30, %cst_18 {dimension_numbers = #tpu.dot_dimension_numbers<[2], [1], [1], [2], [0, 0, 0, 1, 1, 2], [0], [0]>} : vector<4x8x8xf32>, vector<4x8x8xf32>, vector<4x8x8xf32> -> vector<4x8x8xf32>
    "tpu.trace_stop"() : () -> ()
    %47 = arith.addf %45, %46 : vector<4x8x8xf32>
    %c1_i32 = arith.constant 1 : i32
    %48 = tpu.reciprocal %43 : vector<4x8x1xf32> -> vector<4x8x1xf32>
    %49 = vector.broadcast %48 : vector<4x8x1xf32> to vector<4x8x8xf32>
    %50 = arith.mulf %47, %49 : vector<4x8x8xf32>
    %51 = vector.extract_strided_slice %50 {offsets = [0, 0, 0], sizes = [1, 8, 8], strides = [1, 1, 1]} : vector<4x8x8xf32> to vector<1x8x8xf32>
    %52 = vector.shape_cast %51 : vector<1x8x8xf32> to vector<8x8xf32>
    %53 = vector.extract_strided_slice %50 {offsets = [1, 0, 0], sizes = [1, 8, 8], strides = [1, 1, 1]} : vector<4x8x8xf32> to vector<1x8x8xf32>
    %54 = vector.shape_cast %53 : vector<1x8x8xf32> to vector<8x8xf32>
    %55 = vector.extract_strided_slice %50 {offsets = [2, 0, 0], sizes = [1, 8, 8], strides = [1, 1, 1]} : vector<4x8x8xf32> to vector<1x8x8xf32>
    %56 = vector.shape_cast %55 : vector<1x8x8xf32> to vector<8x8xf32>
    %57 = vector.extract_strided_slice %50 {offsets = [3, 0, 0], sizes = [1, 8, 8], strides = [1, 1, 1]} : vector<4x8x8xf32> to vector<1x8x8xf32>
    %58 = vector.shape_cast %57 : vector<1x8x8xf32> to vector<8x8xf32>
    %59 = tpu.concatenate %52, %54, %56, %58 in 1 : vector<8x8xf32>, vector<8x8xf32>, vector<8x8xf32>, vector<8x8xf32> -> vector<8x32xf32>
    %c0_19 = arith.constant 0 : index
    %c0_20 = arith.constant 0 : index
    %60 = vector.load %arg9[%c0_19, %c0_20] : memref<32x32xf32, #tpu.memory_space<vmem>>, vector<32x32xf32>
    %cst_21 = arith.constant dense<0.000000e+00> : vector<8x32xf32>
    %61 = tpu.matmul %59, %60, %cst_21 {dimension_numbers = #tpu.dot_dimension_numbers<[1], [0], [0], [1], [0, 0, 1, 1], [], []>} : vector<8x32xf32>, vector<32x32xf32>, vector<8x32xf32> -> vector<8x32xf32>
    %c0_22 = arith.constant 0 : index
    %c0_23 = arith.constant 0 : index
    %62 = vector.load %arg10[%c0_22, %c0_23] : memref<1x32xf32, #tpu.memory_space<vmem>>, vector<1x32xf32>
    %63 = vector.broadcast %62 : vector<1x32xf32> to vector<8x32xf32>
    %64 = arith.addf %61, %63 : vector<8x32xf32>
    %65 = arith.addf %7, %64 : vector<8x32xf32>
    %cst_24 = arith.constant dense<0.000000e+00> : vector<8xf32>
    %66 = vector.multi_reduction <add>, %65, %cst_24 [1] : vector<8x32xf32> to vector<8xf32>
    %67 = vector.shape_cast %66 : vector<8xf32> to vector<8x1xf32>
    %cst_25 = arith.constant 3.200000e+01 : f32
    %68 = vector.broadcast %cst_25 : f32 to vector<8x1xf32>
    %69 = arith.divf %67, %68 : vector<8x1xf32>
    %70 = vector.broadcast %69 : vector<8x1xf32> to vector<8x32xf32>
    %71 = arith.subf %65, %70 : vector<8x32xf32>
    %72 = arith.mulf %71, %71 : vector<8x32xf32>
    %cst_26 = arith.constant dense<0.000000e+00> : vector<8xf32>
    %73 = vector.multi_reduction <add>, %72, %cst_26 [1] : vector<8x32xf32> to vector<8xf32>
    %74 = vector.shape_cast %73 : vector<8xf32> to vector<8x1xf32>
    %cst_27 = arith.constant 3.200000e+01 : f32
    %75 = vector.broadcast %cst_27 : f32 to vector<8x1xf32>
    %76 = arith.divf %74, %75 : vector<8x1xf32>
    %77 = vector.broadcast %69 : vector<8x1xf32> to vector<8x32xf32>
    %78 = arith.subf %65, %77 : vector<8x32xf32>
    %cst_28 = arith.constant 9.99999974E-6 : f32
    %79 = vector.broadcast %cst_28 : f32 to vector<8x1xf32>
    %80 = arith.addf %76, %79 : vector<8x1xf32>
    %81 = math.rsqrt %80 : vector<8x1xf32>
    %82 = vector.broadcast %81 : vector<8x1xf32> to vector<8x32xf32>
    %83 = arith.mulf %78, %82 : vector<8x32xf32>
    %c0_29 = arith.constant 0 : index
    %c0_30 = arith.constant 0 : index
    %84 = vector.load %arg11[%c0_29, %c0_30] : memref<1x32xf32, #tpu.memory_space<vmem>>, vector<1x32xf32>
    %85 = vector.broadcast %84 : vector<1x32xf32> to vector<8x32xf32>
    %86 = arith.mulf %83, %85 : vector<8x32xf32>
    %c0_31 = arith.constant 0 : index
    %c0_32 = arith.constant 0 : index
    %87 = vector.load %arg12[%c0_31, %c0_32] : memref<1x32xf32, #tpu.memory_space<vmem>>, vector<1x32xf32>
    %88 = vector.broadcast %87 : vector<1x32xf32> to vector<8x32xf32>
    %89 = arith.addf %86, %88 : vector<8x32xf32>
    %c0_33 = arith.constant 0 : index
    %c0_34 = arith.constant 0 : index
    %90 = vector.load %arg13[%c0_33, %c0_34] : memref<32x64xf32, #tpu.memory_space<vmem>>, vector<32x64xf32>
    %cst_35 = arith.constant dense<0.000000e+00> : vector<8x64xf32>
    %91 = tpu.matmul %89, %90, %cst_35 {dimension_numbers = #tpu.dot_dimension_numbers<[1], [0], [0], [1], [0, 0, 1, 1], [], []>} : vector<8x32xf32>, vector<32x64xf32>, vector<8x64xf32> -> vector<8x64xf32>
    %c0_36 = arith.constant 0 : index
    %c0_37 = arith.constant 0 : index
    %92 = vector.load %arg14[%c0_36, %c0_37] : memref<1x64xf32, #tpu.memory_space<vmem>>, vector<1x64xf32>
    %93 = vector.broadcast %92 : vector<1x64xf32> to vector<8x64xf32>
    %94 = arith.addf %91, %93 : vector<8x64xf32>
    %95 = arith.negf %94 : vector<8x64xf32>
    %96 = math.exp %95 : vector<8x64xf32>
    %cst_38 = arith.constant 1.000000e+00 : f32
    %97 = vector.broadcast %cst_38 : f32 to vector<8x64xf32>
    %98 = arith.addf %97, %96 : vector<8x64xf32>
    %99 = arith.divf %97, %98 : vector<8x64xf32>
    %100 = arith.mulf %94, %99 : vector<8x64xf32>
    %c0_39 = arith.constant 0 : index
    %c0_40 = arith.constant 0 : index
    %101 = vector.load %arg15[%c0_39, %c0_40] : memref<64x32xf32, #tpu.memory_space<vmem>>, vector<64x32xf32>
    %cst_41 = arith.constant dense<0.000000e+00> : vector<8x32xf32>
    %102 = tpu.matmul %100, %101, %cst_41 {dimension_numbers = #tpu.dot_dimension_numbers<[1], [0], [0], [1], [0, 0, 1, 1], [], []>} : vector<8x64xf32>, vector<64x32xf32>, vector<8x32xf32> -> vector<8x32xf32>
    %c0_42 = arith.constant 0 : index
    %c0_43 = arith.constant 0 : index
    %103 = vector.load %arg16[%c0_42, %c0_43] : memref<1x32xf32, #tpu.memory_space<vmem>>, vector<1x32xf32>
    %104 = vector.broadcast %103 : vector<1x32xf32> to vector<8x32xf32>
    %105 = arith.addf %102, %104 : vector<8x32xf32>
    %106 = arith.addf %89, %105 : vector<8x32xf32>
    %cst_44 = arith.constant dense<0.000000e+00> : vector<8xf32>
    %107 = vector.multi_reduction <add>, %106, %cst_44 [1] : vector<8x32xf32> to vector<8xf32>
    %108 = vector.shape_cast %107 : vector<8xf32> to vector<8x1xf32>
    %cst_45 = arith.constant 3.200000e+01 : f32
    %109 = vector.broadcast %cst_45 : f32 to vector<8x1xf32>
    %110 = arith.divf %108, %109 : vector<8x1xf32>
    %111 = vector.broadcast %110 : vector<8x1xf32> to vector<8x32xf32>
    %112 = arith.subf %106, %111 : vector<8x32xf32>
    %113 = arith.mulf %112, %112 : vector<8x32xf32>
    %cst_46 = arith.constant dense<0.000000e+00> : vector<8xf32>
    %114 = vector.multi_reduction <add>, %113, %cst_46 [1] : vector<8x32xf32> to vector<8xf32>
    %115 = vector.shape_cast %114 : vector<8xf32> to vector<8x1xf32>
    %cst_47 = arith.constant 3.200000e+01 : f32
    %116 = vector.broadcast %cst_47 : f32 to vector<8x1xf32>
    %117 = arith.divf %115, %116 : vector<8x1xf32>
    %118 = vector.broadcast %110 : vector<8x1xf32> to vector<8x32xf32>
    %119 = arith.subf %106, %118 : vector<8x32xf32>
    %cst_48 = arith.constant 9.99999974E-6 : f32
    %120 = vector.broadcast %cst_48 : f32 to vector<8x1xf32>
    %121 = arith.addf %117, %120 : vector<8x1xf32>
    %122 = math.rsqrt %121 : vector<8x1xf32>
    %123 = vector.broadcast %122 : vector<8x1xf32> to vector<8x32xf32>
    %124 = arith.mulf %119, %123 : vector<8x32xf32>
    %c0_49 = arith.constant 0 : index
    %c0_50 = arith.constant 0 : index
    %125 = vector.load %arg17[%c0_49, %c0_50] : memref<1x32xf32, #tpu.memory_space<vmem>>, vector<1x32xf32>
    %126 = vector.broadcast %125 : vector<1x32xf32> to vector<8x32xf32>
    %127 = arith.mulf %124, %126 : vector<8x32xf32>
    %c0_51 = arith.constant 0 : index
    %c0_52 = arith.constant 0 : index
    %128 = vector.load %arg18[%c0_51, %c0_52] : memref<1x32xf32, #tpu.memory_space<vmem>>, vector<1x32xf32>
    %129 = vector.broadcast %128 : vector<1x32xf32> to vector<8x32xf32>
    %130 = arith.addf %127, %129 : vector<8x32xf32>
    %c0_53 = arith.constant 0 : index
    %c0_54 = arith.constant 0 : index
    %c0_55 = arith.constant 0 : index
    %131 = vector.load %arg19[%c0_53, %c0_54, %c0_55] : memref<1x8x32xf32, #tpu.memory_space<vmem>>, vector<1x8x32xf32>
    %132 = vector.shape_cast %131 : vector<1x8x32xf32> to vector<8x32xf32>
    %133 = vector.shape_cast %130 : vector<8x32xf32> to vector<1x8x32xf32>
    tpu.vector_store %arg19[%c0_53, %c0_54, %c0_55], %133 {strides = array<i32>} : memref<1x8x32xf32, #tpu.memory_space<vmem>>, vector<1x8x32xf32>,
    return
  }
  func.func @transform_0(%arg0: i32, %arg1: i32) -> (i32, i32, i32) {
    %c0_i32 = arith.constant 0 : i32
    %c0_i32_0 = arith.constant 0 : i32
    %c0_i32_1 = arith.constant 0 : i32
    return %arg0, %c0_i32, %c0_i32_0 : i32, i32, i32
  }
  func.func @transform_1(%arg0: i32, %arg1: i32) -> (i32, i32) {
    %c0_i32 = arith.constant 0 : i32
    %c0_i32_0 = arith.constant 0 : i32
    %c0_i32_1 = arith.constant 0 : i32
    return %c0_i32, %c0_i32_0 : i32, i32
  }
  func.func @transform_2(%arg0: i32, %arg1: i32) -> (i32, i32) {
    %c0_i32 = arith.constant 0 : i32
    %c0_i32_0 = arith.constant 0 : i32
    %c0_i32_1 = arith.constant 0 : i32
    return %c0_i32, %c0_i32_0 : i32, i32
  }
  func.func @transform_3(%arg0: i32, %arg1: i32) -> (i32, i32) {
    %c0_i32 = arith.constant 0 : i32
    %c0_i32_0 = arith.constant 0 : i32
    %c0_i32_1 = arith.constant 0 : i32
    return %c0_i32, %c0_i32_0 : i32, i32
  }
  func.func @transform_4(%arg0: i32, %arg1: i32) -> (i32, i32) {
    %c0_i32 = arith.constant 0 : i32
    %c0_i32_0 = arith.constant 0 : i32
    %c0_i32_1 = arith.constant 0 : i32
    return %c0_i32, %c0_i32_0 : i32, i32
  }
  func.func @transform_5(%arg0: i32, %arg1: i32) -> (i32, i32) {
    %c0_i32 = arith.constant 0 : i32
    %c0_i32_0 = arith.constant 0 : i32
    %c0_i32_1 = arith.constant 0 : i32
    return %c0_i32, %c0_i32_0 : i32, i32
  }
  func.func @transform_6(%arg0: i32, %arg1: i32) -> (i32, i32) {
    %c0_i32 = arith.constant 0 : i32
    %c0_i32_0 = arith.constant 0 : i32
    %c0_i32_1 = arith.constant 0 : i32
    return %c0_i32, %c0_i32_0 : i32, i32
  }
  func.func @transform_7(%arg0: i32, %arg1: i32) -> (i32, i32) {
    %c0_i32 = arith.constant 0 : i32
    %c0_i32_0 = arith.constant 0 : i32
    %c0_i32_1 = arith.constant 0 : i32
    return %c0_i32, %c0_i32_0 : i32, i32
  }
  func.func @transform_8(%arg0: i32, %arg1: i32) -> (i32, i32) {
    %c0_i32 = arith.constant 0 : i32
    %c0_i32_0 = arith.constant 0 : i32
    %c0_i32_1 = arith.constant 0 : i32
    return %c0_i32, %c0_i32_0 : i32, i32
  }
  func.func @transform_9(%arg0: i32, %arg1: i32) -> (i32, i32) {
    %c0_i32 = arith.constant 0 : i32
    %c0_i32_0 = arith.constant 0 : i32
    %c0_i32_1 = arith.constant 0 : i32
    return %c0_i32, %c0_i32_0 : i32, i32
  }
  func.func @transform_10(%arg0: i32, %arg1: i32) -> (i32, i32) {
    %c0_i32 = arith.constant 0 : i32
    %c0_i32_0 = arith.constant 0 : i32
    %c0_i32_1 = arith.constant 0 : i32
    return %c0_i32, %c0_i32_0 : i32, i32
  }
  func.func @transform_11(%arg0: i32, %arg1: i32) -> (i32, i32) {
    %c0_i32 = arith.constant 0 : i32
    %c0_i32_0 = arith.constant 0 : i32
    %c0_i32_1 = arith.constant 0 : i32
    return %c0_i32, %c0_i32_0 : i32, i32
  }
  func.func @transform_12(%arg0: i32, %arg1: i32) -> (i32, i32) {
    %c0_i32 = arith.constant 0 : i32
    %c0_i32_0 = arith.constant 0 : i32
    %c0_i32_1 = arith.constant 0 : i32
    return %c0_i32, %c0_i32_0 : i32, i32
  }
  func.func @transform_13(%arg0: i32, %arg1: i32) -> (i32, i32) {
    %c0_i32 = arith.constant 0 : i32
    %c0_i32_0 = arith.constant 0 : i32
    %c0_i32_1 = arith.constant 0 : i32
    return %c0_i32, %c0_i32_0 : i32, i32
  }
  func.func @transform_14(%arg0: i32, %arg1: i32) -> (i32, i32) {
    %c0_i32 = arith.constant 0 : i32
    %c0_i32_0 = arith.constant 0 : i32
    %c0_i32_1 = arith.constant 0 : i32
    return %c0_i32, %c0_i32_0 : i32, i32
  }
  func.func @transform_15(%arg0: i32, %arg1: i32) -> (i32, i32) {
    %c0_i32 = arith.constant 0 : i32
    %c0_i32_0 = arith.constant 0 : i32
    %c0_i32_1 = arith.constant 0 : i32
    return %c0_i32, %c0_i32_0 : i32, i32
  }
  func.func @transform_16(%arg0: i32, %arg1: i32) -> (i32, i32) {
    %c0_i32 = arith.constant 0 : i32
    %c0_i32_0 = arith.constant 0 : i32
    %c0_i32_1 = arith.constant 0 : i32
    return %c0_i32, %c0_i32_0 : i32, i32
  }
  func.func @transform_17(%arg0: i32, %arg1: i32) -> (i32, i32, i32) {
    %c0_i32 = arith.constant 0 : i32
    %c0_i32_0 = arith.constant 0 : i32
    return %arg0, %arg1, %c0_i32 : i32, i32, i32
  }
}

module attributes {stable_mosaic.version = 11 : i64} {
  func.func @encoder_block_kernel(%arg0: i32, %arg1: i32, %arg2: memref<1x8x32xf32, #tpu.memory_space<vmem>>, %arg3: memref<32x32xf32, #tpu.memory_space<vmem>>, %arg4: memref<1x32xf32, #tpu.memory_space<vmem>>, %arg5: memref<32x32xf32, #tpu.memory_space<vmem>>, %arg6: memref<1x32xf32, #tpu.memory_space<vmem>>, %arg7: memref<32x32xf32, #tpu.memory_space<vmem>>, %arg8: memref<1x32xf32, #tpu.memory_space<vmem>>, %arg9: memref<32x32xf32, #tpu.memory_space<vmem>>, %arg10: memref<1x32xf32, #tpu.memory_space<vmem>>, %arg11: memref<1x32xf32, #tpu.memory_space<vmem>>, %arg12: memref<1x32xf32, #tpu.memory_space<vmem>>, %arg13: memref<32x64xf32, #tpu.memory_space<vmem>>, %arg14: memref<1x64xf32, #tpu.memory_space<vmem>>, %arg15: memref<64x32xf32, #tpu.memory_space<vmem>>, %arg16: memref<1x32xf32, #tpu.memory_space<vmem>>, %arg17: memref<1x32xf32, #tpu.memory_space<vmem>>, %arg18: memref<1x32xf32, #tpu.memory_space<vmem>>, %arg19: memref<1x8x32xf32, #tpu.memory_space<vmem>>, %arg20: memref<4x8x8xf32, #tpu.memory_space<vmem>>, %arg21: memref<4x8x8xf32, #tpu.memory_space<vmem>>) attributes {dimension_semantics = [#tpu.dimension_semantics<parallel>, #tpu.dimension_semantics<arbitrary>], iteration_bounds = array<i64: 2, 1>, scalar_prefetch = 0 : i64, scratch_operands = 2 : i64, tpu.core_type = #tpu.core_type<tc>, window_params = [{transform_indices = @transform_0, window_bounds = array<i64: 1, 8, 32>}, {pipeline_mode = #tpu.pipeline_mode<synchronous>, transform_indices = @transform_1, window_bounds = array<i64: 32, 32>}, {pipeline_mode = #tpu.pipeline_mode<synchronous>, transform_indices = @transform_2, window_bounds = array<i64: 1, 32>}, {pipeline_mode = #tpu.pipeline_mode<synchronous>, transform_indices = @transform_3, window_bounds = array<i64: 32, 32>}, {pipeline_mode = #tpu.pipeline_mode<synchronous>, transform_indices = @transform_4, window_bounds = array<i64: 1, 32>}, {pipeline_mode = #tpu.pipeline_mode<synchronous>, transform_indices = @transform_5, window_bounds = array<i64: 32, 32>}, {pipeline_mode = #tpu.pipeline_mode<synchronous>, transform_indices = @transform_6, window_bounds = array<i64: 1, 32>}, {pipeline_mode = #tpu.pipeline_mode<synchronous>, transform_indices = @transform_7, window_bounds = array<i64: 32, 32>}, {pipeline_mode = #tpu.pipeline_mode<synchronous>, transform_indices = @transform_8, window_bounds = array<i64: 1, 32>}, {pipeline_mode = #tpu.pipeline_mode<synchronous>, transform_indices = @transform_9, window_bounds = array<i64: 1, 32>}, {pipeline_mode = #tpu.pipeline_mode<synchronous>, transform_indices = @transform_10, window_bounds = array<i64: 1, 32>}, {pipeline_mode = #tpu.pipeline_mode<synchronous>, transform_indices = @transform_11, window_bounds = array<i64: 32, 64>}, {pipeline_mode = #tpu.pipeline_mode<synchronous>, transform_indices = @transform_12, window_bounds = array<i64: 1, 64>}, {pipeline_mode = #tpu.pipeline_mode<synchronous>, transform_indices = @transform_13, window_bounds = array<i64: 64, 32>}, {pipeline_mode = #tpu.pipeline_mode<synchronous>, transform_indices = @transform_14, window_bounds = array<i64: 1, 32>}, {pipeline_mode = #tpu.pipeline_mode<synchronous>, transform_indices = @transform_15, window_bounds = array<i64: 1, 32>}, {pipeline_mode = #tpu.pipeline_mode<synchronous>, transform_indices = @transform_16, window_bounds = array<i64: 1, 32>}, {transform_indices = @transform_17, window_bounds = array<i64: 1, 8, 32>}]} {
    %c0_i32 = arith.constant 0 : i32
    %0 = arith.cmpi eq, %arg1, %c0_i32 : i32
    %1 = arith.extui %0 : i1 to i32
    %c0_i32_0 = arith.constant 0 : i32
    %2 = arith.cmpi ne, %1, %c0_i32_0 : i32
    scf.if %2 {
      %c0_56 = arith.constant 0 : index
      %c0_57 = arith.constant 0 : index
      %c0_58 = arith.constant 0 : index
      %134 = vector.load %arg2[%c0_56, %c0_57, %c0_58] : memref<1x8x32xf32, #tpu.memory_space<vmem>>, vector<1x8x32xf32>
      %135 = vector.shape_cast %134 : vector<1x8x32xf32> to vector<8x32xf32>
      %c0_59 = arith.constant 0 : index
      %c0_60 = arith.constant 0 : index
      %136 = vector.load %arg5[%c0_59, %c0_60] : memref<32x32xf32, #tpu.memory_space<vmem>>, vector<32x32xf32>
      %cst_61 = arith.constant dense<0.000000e+00> : vector<8x32xf32>
      %137 = tpu.matmul %135, %136, %cst_61 {dimension_numbers = #tpu.dot_dimension_numbers<[1], [0], [0], [1], [0, 0, 1, 1], [], []>} : vector<8x32xf32>, vector<32x32xf32>, vector<8x32xf32> -> vector<8x32xf32>
      %c0_62 = arith.constant 0 : index
      %c0_63 = arith.constant 0 : index
      %138 = vector.load %arg6[%c0_62, %c0_63] : memref<1x32xf32, #tpu.memory_space<vmem>>, vector<1x32xf32>
      %139 = vector.broadcast %138 : vector<1x32xf32> to vector<8x32xf32>
      %140 = arith.addf %137, %139 : vector<8x32xf32>
      %c0_64 = arith.constant 0 : index
      %c0_65 = arith.constant 0 : index
      %141 = vector.load %arg7[%c0_64, %c0_65] : memref<32x32xf32, #tpu.memory_space<vmem>>, vector<32x32xf32>
      %cst_66 = arith.constant dense<0.000000e+00> : vector<8x32xf32>
      %142 = tpu.matmul %135, %141, %cst_66 {dimension_numbers = #tpu.dot_dimension_numbers<[1], [0], [0], [1], [0, 0, 1, 1], [], []>} : vector<8x32xf32>, vector<32x32xf32>, vector<8x32xf32> -> vector<8x32xf32>
      %c0_67 = arith.constant 0 : index
      %c0_68 = arith.constant 0 : index
      %143 = vector.load %arg8[%c0_67, %c0_68] : memref<1x32xf32, #tpu.memory_space<vmem>>, vector<1x32xf32>
      %144 = vector.broadcast %143 : vector<1x32xf32> to vector<8x32xf32>
      %145 = arith.addf %142, %144 : vector<8x32xf32>
      %146 = vector.extract_strided_slice %140 {offsets = [0, 0], sizes = [8, 8], strides = [1, 1]} : vector<8x32xf32> to vector<8x8xf32>
      %147 = vector.extract_strided_slice %140 {offsets = [0, 8], sizes = [8, 8], strides = [1, 1]} : vector<8x32xf32> to vector<8x8xf32>
      %148 = vector.extract_strided_slice %140 {offsets = [0, 16], sizes = [8, 8], strides = [1, 1]} : vector<8x32xf32> to vector<8x8xf32>
      %149 = vector.extract_strided_slice %140 {offsets = [0, 24], sizes = [8, 8], strides = [1, 1]} : vector<8x32xf32> to vector<8x8xf32>
      %150 = vector.shape_cast %146 : vector<8x8xf32> to vector<1x8x8xf32>
      %151 = vector.shape_cast %147 : vector<8x8xf32> to vector<1x8x8xf32>
      %152 = vector.shape_cast %148 : vector<8x8xf32> to vector<1x8x8xf32>
      %153 = vector.shape_cast %149 : vector<8x8xf32> to vector<1x8x8xf32>
      %154 = tpu.concatenate %150, %151, %152, %153 in 0 : vector<1x8x8xf32>, vector<1x8x8xf32>, vector<1x8x8xf32>, vector<1x8x8xf32> -> vector<4x8x8xf32>
      %c0_69 = arith.constant 0 : index
      %c0_70 = arith.constant 0 : index
      %c0_71 = arith.constant 0 : index
      %155 = vector.load %arg20[%c0_69, %c0_70, %c0_71] : memref<4x8x8xf32, #tpu.memory_space<vmem>>, vector<4x8x8xf32>
      tpu.vector_store %arg20[%c0_69, %c0_70, %c0_71], %154 {strides = array<i32>} : memref<4x8x8xf32, #tpu.memory_space<vmem>>, vector<4x8x8xf32>,
      %156 = vector.extract_strided_slice %145 {offsets = [0, 0], sizes = [8, 8], strides = [1, 1]} : vector<8x32xf32> to vector<8x8xf32>
      %157 = vector.extract_strided_slice %145 {offsets = [0, 8], sizes = [8, 8], strides = [1, 1]} : vector<8x32xf32> to vector<8x8xf32>
      %158 = vector.extract_strided_slice %145 {offsets = [0, 16], sizes = [8, 8], strides = [1, 1]} : vector<8x32xf32> to vector<8x8xf32>
      %159 = vector.extract_strided_slice %145 {offsets = [0, 24], sizes = [8, 8], strides = [1, 1]} : vector<8x32xf32> to vector<8x8xf32>
      %160 = vector.shape_cast %156 : vector<8x8xf32> to vector<1x8x8xf32>
      %161 = vector.shape_cast %157 : vector<8x8xf32> to vector<1x8x8xf32>
      %162 = vector.shape_cast %158 : vector<8x8xf32> to vector<1x8x8xf32>
      %163 = vector.shape_cast %159 : vector<8x8xf32> to vector<1x8x8xf32>
      %164 = tpu.concatenate %160, %161, %162, %163 in 0 : vector<1x8x8xf32>, vector<1x8x8xf32>, vector<1x8x8xf32>, vector<1x8x8xf32> -> vector<4x8x8xf32>
      %c0_72 = arith.constant 0 : index
      %c0_73 = arith.constant 0 : index
      %c0_74 = arith.constant 0 : index
      %165 = vector.load %arg21[%c0_72, %c0_73, %c0_74] : memref<4x8x8xf32, #tpu.memory_space<vmem>>, vector<4x8x8xf32>
      tpu.vector_store %arg21[%c0_72, %c0_73, %c0_74], %164 {strides = array<i32>} : memref<4x8x8xf32, #tpu.memory_space<vmem>>, vector<4x8x8xf32>,
    } else {
    }
    %c8_i32 = arith.constant 8 : i32
    %3 = arith.muli %arg1, %c8_i32 : i32
    %4 = tpu.assume_multiple %3, 8 : i32
    %c0 = arith.constant 0 : index
    %5 = arith.index_cast %4 : i32 to index
    %c0_1 = arith.constant 0 : index
    %6 = vector.load %arg2[%c0, %5, %c0_1] : memref<1x8x32xf32, #tpu.memory_space<vmem>>, vector<1x8x32xf32>
    %7 = vector.shape_cast %6 : vector<1x8x32xf32> to vector<8x32xf32>
    %c0_2 = arith.constant 0 : index
    %c0_3 = arith.constant 0 : index
    %8 = vector.load %arg3[%c0_2, %c0_3] : memref<32x32xf32, #tpu.memory_space<vmem>>, vector<32x32xf32>
    %cst = arith.constant dense<0.000000e+00> : vector<8x32xf32>
    %9 = tpu.matmul %7, %8, %cst {dimension_numbers = #tpu.dot_dimension_numbers<[1], [0], [0], [1], [0, 0, 1, 1], [], []>} : vector<8x32xf32>, vector<32x32xf32>, vector<8x32xf32> -> vector<8x32xf32>
    %c0_4 = arith.constant 0 : index
    %c0_5 = arith.constant 0 : index
    %10 = vector.load %arg4[%c0_4, %c0_5] : memref<1x32xf32, #tpu.memory_space<vmem>>, vector<1x32xf32>
    %11 = vector.broadcast %10 : vector<1x32xf32> to vector<8x32xf32>
    %12 = arith.addf %9, %11 : vector<8x32xf32>
    %13 = vector.extract_strided_slice %12 {offsets = [0, 0], sizes = [8, 8], strides = [1, 1]} : vector<8x32xf32> to vector<8x8xf32>
    %14 = vector.extract_strided_slice %12 {offsets = [0, 8], sizes = [8, 8], strides = [1, 1]} : vector<8x32xf32> to vector<8x8xf32>
    %15 = vector.extract_strided_slice %12 {offsets = [0, 16], sizes = [8, 8], strides = [1, 1]} : vector<8x32xf32> to vector<8x8xf32>
    %16 = vector.extract_strided_slice %12 {offsets = [0, 24], sizes = [8, 8], strides = [1, 1]} : vector<8x32xf32> to vector<8x8xf32>
    %17 = vector.shape_cast %13 : vector<8x8xf32> to vector<1x8x8xf32>
    %18 = vector.shape_cast %14 : vector<8x8xf32> to vector<1x8x8xf32>
    %19 = vector.shape_cast %15 : vector<8x8xf32> to vector<1x8x8xf32>
    %20 = vector.shape_cast %16 : vector<8x8xf32> to vector<1x8x8xf32>
    %21 = tpu.concatenate %17, %18, %19, %20 in 0 : vector<1x8x8xf32>, vector<1x8x8xf32>, vector<1x8x8xf32>, vector<1x8x8xf32> -> vector<4x8x8xf32>
    %cst_6 = arith.constant 0xFF800000 : f32
    %22 = vector.broadcast %cst_6 : f32 to vector<4x8x1xf32>
    %cst_7 = arith.constant 0.000000e+00 : f32
    %23 = vector.broadcast %cst_7 : f32 to vector<4x8x1xf32>
    %cst_8 = arith.constant 0.000000e+00 : f32
    %24 = vector.broadcast %cst_8 : f32 to vector<4x8x8xf32>
    %c0_i32_9 = arith.constant 0 : i32
    %c8_i32_10 = arith.constant 8 : i32
    %25 = arith.muli %c0_i32_9, %c8_i32_10 : i32
    %26 = tpu.assume_multiple %25, 8 : i32
    %c0_11 = arith.constant 0 : index
    %27 = arith.index_cast %26 : i32 to index
    %c0_12 = arith.constant 0 : index
    %28 = vector.load %arg20[%c0_11, %27, %c0_12] : memref<4x8x8xf32, #tpu.memory_space<vmem>>, vector<4x8x8xf32>
    %c0_13 = arith.constant 0 : index
    %29 = arith.index_cast %26 : i32 to index
    %c0_14 = arith.constant 0 : index
    %30 = vector.load %arg21[%c0_13, %29, %c0_14] : memref<4x8x8xf32, #tpu.memory_space<vmem>>, vector<4x8x8xf32>
    "tpu.trace_start"() <{level = 10 : i32, message = "hqd,hkd->hqk"}> : () -> ()
    %cst_15 = arith.constant dense<0.000000e+00> : vector<4x8x8xf32>
    %31 = tpu.matmul %21, %28, %cst_15 {dimension_numbers = #tpu.dot_dimension_numbers<[2], [2], [1], [1], [0, 0, 0, 1, 1, 1], [0], [0]>} : vector<4x8x8xf32>, vector<4x8x8xf32>, vector<4x8x8xf32> -> vector<4x8x8xf32>
    "tpu.trace_stop"() : () -> ()
    %cst_16 = arith.constant dense<0xFF800000> : vector<4x8xf32>
    %32 = vector.multi_reduction <maximumf>, %31, %cst_16 [2] : vector<4x8x8xf32> to vector<4x8xf32>
    %33 = vector.shape_cast %32 : vector<4x8xf32> to vector<4x8x1xf32>
    %34 = arith.maximumf %22, %33 : vector<4x8x1xf32>
    %35 = arith.subf %22, %34 : vector<4x8x1xf32>
    %36 = math.exp %35 : vector<4x8x1xf32>
    %37 = vector.broadcast %34 : vector<4x8x1xf32> to vector<4x8x8xf32>
    %38 = arith.subf %31, %37 : vector<4x8x8xf32>
    %39 = math.exp %38 : vector<4x8x8xf32>
    %40 = arith.mulf %36, %23 : vector<4x8x1xf32>
    %cst_17 = arith.constant dense<0.000000e+00> : vector<4x8xf32>
    %41 = vector.multi_reduction <add>, %39, %cst_17 [2] : vector<4x8x8xf32> to vector<4x8xf32>
    %42 = vector.shape_cast %41 : vector<4x8xf32> to vector<4x8x1xf32>
    %43 = arith.addf %40, %42 : vector<4x8x1xf32>
    %44 = vector.broadcast %36 : vector<4x8x1xf32> to vector<4x8x8xf32>
    %45 = arith.mulf %44, %24 : vector<4x8x8xf32>
    "tpu.trace_start"() <{level = 10 : i32, message = "hqk,hkd->hqd"}> : () -> ()
    %cst_18 = arith.constant dense<0.000000e+00> : vector<4x8x8xf32>
    %46 = tpu.matmul %39, %30, %cst_18 {dimension_numbers = #tpu.dot_dimension_numbers<[2], [1], [1], [2], [0, 0, 0, 1, 1, 2], [0], [0]>} : vector<4x8x8xf32>, vector<4x8x8xf32>, vector<4x8x8xf32> -> vector<4x8x8xf32>
    "tpu.trace_stop"() : () -> ()
    %47 = arith.addf %45, %46 : vector<4x8x8xf32>
    %c1_i32 = arith.constant 1 : i32
    %48 = tpu.reciprocal %43 : vector<4x8x1xf32> -> vector<4x8x1xf32>
    %49 = vector.broadcast %48 : vector<4x8x1xf32> to vector<4x8x8xf32>
    %50 = arith.mulf %47, %49 : vector<4x8x8xf32>
    %51 = vector.extract_strided_slice %50 {offsets = [0, 0, 0], sizes = [1, 8, 8], strides = [1, 1, 1]} : vector<4x8x8xf32> to vector<1x8x8xf32>
    %52 = vector.shape_cast %51 : vector<1x8x8xf32> to vector<8x8xf32>
    %53 = vector.extract_strided_slice %50 {offsets = [1, 0, 0], sizes = [1, 8, 8], strides = [1, 1, 1]} : vector<4x8x8xf32> to vector<1x8x8xf32>
    %54 = vector.shape_cast %53 : vector<1x8x8xf32> to vector<8x8xf32>
    %55 = vector.extract_strided_slice %50 {offsets = [2, 0, 0], sizes = [1, 8, 8], strides = [1, 1, 1]} : vector<4x8x8xf32> to vector<1x8x8xf32>
    %56 = vector.shape_cast %55 : vector<1x8x8xf32> to vector<8x8xf32>
    %57 = vector.extract_strided_slice %50 {offsets = [3, 0, 0], sizes = [1, 8, 8], strides = [1, 1, 1]} : vector<4x8x8xf32> to vector<1x8x8xf32>
    %58 = vector.shape_cast %57 : vector<1x8x8xf32> to vector<8x8xf32>
    %59 = tpu.concatenate %52, %54, %56, %58 in 1 : vector<8x8xf32>, vector<8x8xf32>, vector<8x8xf32>, vector<8x8xf32> -> vector<8x32xf32>
    %c0_19 = arith.constant 0 : index
    %c0_20 = arith.constant 0 : index
    %60 = vector.load %arg9[%c0_19, %c0_20] : memref<32x32xf32, #tpu.memory_space<vmem>>, vector<32x32xf32>
    %cst_21 = arith.constant dense<0.000000e+00> : vector<8x32xf32>
    %61 = tpu.matmul %59, %60, %cst_21 {dimension_numbers = #tpu.dot_dimension_numbers<[1], [0], [0], [1], [0, 0, 1, 1], [], []>} : vector<8x32xf32>, vector<32x32xf32>, vector<8x32xf32> -> vector<8x32xf32>
    %c0_22 = arith.constant 0 : index
    %c0_23 = arith.constant 0 : index
    %62 = vector.load %arg10[%c0_22, %c0_23] : memref<1x32xf32, #tpu.memory_space<vmem>>, vector<1x32xf32>
    %63 = vector.broadcast %62 : vector<1x32xf32> to vector<8x32xf32>
    %64 = arith.addf %61, %63 : vector<8x32xf32>
    %65 = arith.addf %7, %64 : vector<8x32xf32>
    %cst_24 = arith.constant dense<0.000000e+00> : vector<8xf32>
    %66 = vector.multi_reduction <add>, %65, %cst_24 [1] : vector<8x32xf32> to vector<8xf32>
    %67 = vector.shape_cast %66 : vector<8xf32> to vector<8x1xf32>
    %cst_25 = arith.constant 3.200000e+01 : f32
    %68 = vector.broadcast %cst_25 : f32 to vector<8x1xf32>
    %69 = arith.divf %67, %68 : vector<8x1xf32>
    %70 = vector.broadcast %69 : vector<8x1xf32> to vector<8x32xf32>
    %71 = arith.subf %65, %70 : vector<8x32xf32>
    %72 = arith.mulf %71, %71 : vector<8x32xf32>
    %cst_26 = arith.constant dense<0.000000e+00> : vector<8xf32>
    %73 = vector.multi_reduction <add>, %72, %cst_26 [1] : vector<8x32xf32> to vector<8xf32>
    %74 = vector.shape_cast %73 : vector<8xf32> to vector<8x1xf32>
    %cst_27 = arith.constant 3.200000e+01 : f32
    %75 = vector.broadcast %cst_27 : f32 to vector<8x1xf32>
    %76 = arith.divf %74, %75 : vector<8x1xf32>
    %77 = vector.broadcast %69 : vector<8x1xf32> to vector<8x32xf32>
    %78 = arith.subf %65, %77 : vector<8x32xf32>
    %cst_28 = arith.constant 9.99999974E-6 : f32
    %79 = vector.broadcast %cst_28 : f32 to vector<8x1xf32>
    %80 = arith.addf %76, %79 : vector<8x1xf32>
    %81 = math.rsqrt %80 : vector<8x1xf32>
    %82 = vector.broadcast %81 : vector<8x1xf32> to vector<8x32xf32>
    %83 = arith.mulf %78, %82 : vector<8x32xf32>
    %c0_29 = arith.constant 0 : index
    %c0_30 = arith.constant 0 : index
    %84 = vector.load %arg11[%c0_29, %c0_30] : memref<1x32xf32, #tpu.memory_space<vmem>>, vector<1x32xf32>
    %85 = vector.broadcast %84 : vector<1x32xf32> to vector<8x32xf32>
    %86 = arith.mulf %83, %85 : vector<8x32xf32>
    %c0_31 = arith.constant 0 : index
    %c0_32 = arith.constant 0 : index
    %87 = vector.load %arg12[%c0_31, %c0_32] : memref<1x32xf32, #tpu.memory_space<vmem>>, vector<1x32xf32>
    %88 = vector.broadcast %87 : vector<1x32xf32> to vector<8x32xf32>
    %89 = arith.addf %86, %88 : vector<8x32xf32>
    %c0_33 = arith.constant 0 : index
    %c0_34 = arith.constant 0 : index
    %90 = vector.load %arg13[%c0_33, %c0_34] : memref<32x64xf32, #tpu.memory_space<vmem>>, vector<32x64xf32>
    %cst_35 = arith.constant dense<0.000000e+00> : vector<8x64xf32>
    %91 = tpu.matmul %89, %90, %cst_35 {dimension_numbers = #tpu.dot_dimension_numbers<[1], [0], [0], [1], [0, 0, 1, 1], [], []>} : vector<8x32xf32>, vector<32x64xf32>, vector<8x64xf32> -> vector<8x64xf32>
    %c0_36 = arith.constant 0 : index
    %c0_37 = arith.constant 0 : index
    %92 = vector.load %arg14[%c0_36, %c0_37] : memref<1x64xf32, #tpu.memory_space<vmem>>, vector<1x64xf32>
    %93 = vector.broadcast %92 : vector<1x64xf32> to vector<8x64xf32>
    %94 = arith.addf %91, %93 : vector<8x64xf32>
    %95 = arith.negf %94 : vector<8x64xf32>
    %96 = math.exp %95 : vector<8x64xf32>
    %cst_38 = arith.constant 1.000000e+00 : f32
    %97 = vector.broadcast %cst_38 : f32 to vector<8x64xf32>
    %98 = arith.addf %97, %96 : vector<8x64xf32>
    %99 = arith.divf %97, %98 : vector<8x64xf32>
    %100 = arith.mulf %94, %99 : vector<8x64xf32>
    %c0_39 = arith.constant 0 : index
    %c0_40 = arith.constant 0 : index
    %101 = vector.load %arg15[%c0_39, %c0_40] : memref<64x32xf32, #tpu.memory_space<vmem>>, vector<64x32xf32>
    %cst_41 = arith.constant dense<0.000000e+00> : vector<8x32xf32>
    %102 = tpu.matmul %100, %101, %cst_41 {dimension_numbers = #tpu.dot_dimension_numbers<[1], [0], [0], [1], [0, 0, 1, 1], [], []>} : vector<8x64xf32>, vector<64x32xf32>, vector<8x32xf32> -> vector<8x32xf32>
    %c0_42 = arith.constant 0 : index
    %c0_43 = arith.constant 0 : index
    %103 = vector.load %arg16[%c0_42, %c0_43] : memref<1x32xf32, #tpu.memory_space<vmem>>, vector<1x32xf32>
    %104 = vector.broadcast %103 : vector<1x32xf32> to vector<8x32xf32>
    %105 = arith.addf %102, %104 : vector<8x32xf32>
    %106 = arith.addf %89, %105 : vector<8x32xf32>
    %cst_44 = arith.constant dense<0.000000e+00> : vector<8xf32>
    %107 = vector.multi_reduction <add>, %106, %cst_44 [1] : vector<8x32xf32> to vector<8xf32>
    %108 = vector.shape_cast %107 : vector<8xf32> to vector<8x1xf32>
    %cst_45 = arith.constant 3.200000e+01 : f32
    %109 = vector.broadcast %cst_45 : f32 to vector<8x1xf32>
    %110 = arith.divf %108, %109 : vector<8x1xf32>
    %111 = vector.broadcast %110 : vector<8x1xf32> to vector<8x32xf32>
    %112 = arith.subf %106, %111 : vector<8x32xf32>
    %113 = arith.mulf %112, %112 : vector<8x32xf32>
    %cst_46 = arith.constant dense<0.000000e+00> : vector<8xf32>
    %114 = vector.multi_reduction <add>, %113, %cst_46 [1] : vector<8x32xf32> to vector<8xf32>
    %115 = vector.shape_cast %114 : vector<8xf32> to vector<8x1xf32>
    %cst_47 = arith.constant 3.200000e+01 : f32
    %116 = vector.broadcast %cst_47 : f32 to vector<8x1xf32>
    %117 = arith.divf %115, %116 : vector<8x1xf32>
    %118 = vector.broadcast %110 : vector<8x1xf32> to vector<8x32xf32>
    %119 = arith.subf %106, %118 : vector<8x32xf32>
    %cst_48 = arith.constant 9.99999974E-6 : f32
    %120 = vector.broadcast %cst_48 : f32 to vector<8x1xf32>
    %121 = arith.addf %117, %120 : vector<8x1xf32>
    %122 = math.rsqrt %121 : vector<8x1xf32>
    %123 = vector.broadcast %122 : vector<8x1xf32> to vector<8x32xf32>
    %124 = arith.mulf %119, %123 : vector<8x32xf32>
    %c0_49 = arith.constant 0 : index
    %c0_50 = arith.constant 0 : index
    %125 = vector.load %arg17[%c0_49, %c0_50] : memref<1x32xf32, #tpu.memory_space<vmem>>, vector<1x32xf32>
    %126 = vector.broadcast %125 : vector<1x32xf32> to vector<8x32xf32>
    %127 = arith.mulf %124, %126 : vector<8x32xf32>
    %c0_51 = arith.constant 0 : index
    %c0_52 = arith.constant 0 : index
    %128 = vector.load %arg18[%c0_51, %c0_52] : memref<1x32xf32, #tpu.memory_space<vmem>>, vector<1x32xf32>
    %129 = vector.broadcast %128 : vector<1x32xf32> to vector<8x32xf32>
    %130 = arith.addf %127, %129 : vector<8x32xf32>
    %c0_53 = arith.constant 0 : index
    %c0_54 = arith.constant 0 : index
    %c0_55 = arith.constant 0 : index
    %131 = vector.load %arg19[%c0_53, %c0_54, %c0_55] : memref<1x8x32xf32, #tpu.memory_space<vmem>>, vector<1x8x32xf32>
    %132 = vector.shape_cast %131 : vector<1x8x32xf32> to vector<8x32xf32>
    %133 = vector.shape_cast %130 : vector<8x32xf32> to vector<1x8x32xf32>
    tpu.vector_store %arg19[%c0_53, %c0_54, %c0_55], %133 {strides = array<i32>} : memref<1x8x32xf32, #tpu.memory_space<vmem>>, vector<1x8x32xf32>,
    return
  }
  func.func @transform_0(%arg0: i32, %arg1: i32) -> (i32, i32, i32) {
    %c0_i32 = arith.constant 0 : i32
    %c0_i32_0 = arith.constant 0 : i32
    %c0_i32_1 = arith.constant 0 : i32
    return %arg0, %c0_i32, %c0_i32_0 : i32, i32, i32
  }
  func.func @transform_1(%arg0: i32, %arg1: i32) -> (i32, i32) {
    %c0_i32 = arith.constant 0 : i32
    %c0_i32_0 = arith.constant 0 : i32
    %c0_i32_1 = arith.constant 0 : i32
    return %c0_i32, %c0_i32_0 : i32, i32
  }
  func.func @transform_2(%arg0: i32, %arg1: i32) -> (i32, i32) {
    %c0_i32 = arith.constant 0 : i32
    %c0_i32_0 = arith.constant 0 : i32
    %c0_i32_1 = arith.constant 0 : i32
    return %c0_i32, %c0_i32_0 : i32, i32
  }
  func.func @transform_3(%arg0: i32, %arg1: i32) -> (i32, i32) {
    %c0_i32 = arith.constant 0 : i32
    %c0_i32_0 = arith.constant 0 : i32
    %c0_i32_1 = arith.constant 0 : i32
    return %c0_i32, %c0_i32_0 : i32, i32
  }
  func.func @transform_4(%arg0: i32, %arg1: i32) -> (i32, i32) {
    %c0_i32 = arith.constant 0 : i32
    %c0_i32_0 = arith.constant 0 : i32
    %c0_i32_1 = arith.constant 0 : i32
    return %c0_i32, %c0_i32_0 : i32, i32
  }
  func.func @transform_5(%arg0: i32, %arg1: i32) -> (i32, i32) {
    %c0_i32 = arith.constant 0 : i32
    %c0_i32_0 = arith.constant 0 : i32
    %c0_i32_1 = arith.constant 0 : i32
    return %c0_i32, %c0_i32_0 : i32, i32
  }
  func.func @transform_6(%arg0: i32, %arg1: i32) -> (i32, i32) {
    %c0_i32 = arith.constant 0 : i32
    %c0_i32_0 = arith.constant 0 : i32
    %c0_i32_1 = arith.constant 0 : i32
    return %c0_i32, %c0_i32_0 : i32, i32
  }
  func.func @transform_7(%arg0: i32, %arg1: i32) -> (i32, i32) {
    %c0_i32 = arith.constant 0 : i32
    %c0_i32_0 = arith.constant 0 : i32
    %c0_i32_1 = arith.constant 0 : i32
    return %c0_i32, %c0_i32_0 : i32, i32
  }
  func.func @transform_8(%arg0: i32, %arg1: i32) -> (i32, i32) {
    %c0_i32 = arith.constant 0 : i32
    %c0_i32_0 = arith.constant 0 : i32
    %c0_i32_1 = arith.constant 0 : i32
    return %c0_i32, %c0_i32_0 : i32, i32
  }
  func.func @transform_9(%arg0: i32, %arg1: i32) -> (i32, i32) {
    %c0_i32 = arith.constant 0 : i32
    %c0_i32_0 = arith.constant 0 : i32
    %c0_i32_1 = arith.constant 0 : i32
    return %c0_i32, %c0_i32_0 : i32, i32
  }
  func.func @transform_10(%arg0: i32, %arg1: i32) -> (i32, i32) {
    %c0_i32 = arith.constant 0 : i32
    %c0_i32_0 = arith.constant 0 : i32
    %c0_i32_1 = arith.constant 0 : i32
    return %c0_i32, %c0_i32_0 : i32, i32
  }
  func.func @transform_11(%arg0: i32, %arg1: i32) -> (i32, i32) {
    %c0_i32 = arith.constant 0 : i32
    %c0_i32_0 = arith.constant 0 : i32
    %c0_i32_1 = arith.constant 0 : i32
    return %c0_i32, %c0_i32_0 : i32, i32
  }
  func.func @transform_12(%arg0: i32, %arg1: i32) -> (i32, i32) {
    %c0_i32 = arith.constant 0 : i32
    %c0_i32_0 = arith.constant 0 : i32
    %c0_i32_1 = arith.constant 0 : i32
    return %c0_i32, %c0_i32_0 : i32, i32
  }
  func.func @transform_13(%arg0: i32, %arg1: i32) -> (i32, i32) {
    %c0_i32 = arith.constant 0 : i32
    %c0_i32_0 = arith.constant 0 : i32
    %c0_i32_1 = arith.constant 0 : i32
    return %c0_i32, %c0_i32_0 : i32, i32
  }
  func.func @transform_14(%arg0: i32, %arg1: i32) -> (i32, i32) {
    %c0_i32 = arith.constant 0 : i32
    %c0_i32_0 = arith.constant 0 : i32
    %c0_i32_1 = arith.constant 0 : i32
    return %c0_i32, %c0_i32_0 : i32, i32
  }
  func.func @transform_15(%arg0: i32, %arg1: i32) -> (i32, i32) {
    %c0_i32 = arith.constant 0 : i32
    %c0_i32_0 = arith.constant 0 : i32
    %c0_i32_1 = arith.constant 0 : i32
    return %c0_i32, %c0_i32_0 : i32, i32
  }
  func.func @transform_16(%arg0: i32, %arg1: i32) -> (i32, i32) {
    %c0_i32 = arith.constant 0 : i32
    %c0_i32_0 = arith.constant 0 : i32
    %c0_i32_1 = arith.constant 0 : i32
    return %c0_i32, %c0_i32_0 : i32, i32
  }
  func.func @transform_17(%arg0: i32, %arg1: i32) -> (i32, i32, i32) {
    %c0_i32 = arith.constant 0 : i32
    %c0_i32_0 = arith.constant 0 : i32
    return %arg0, %arg1, %c0_i32 : i32, i32, i32
  }
}

</mosaic_0001>

<bundles_post_ra>
// kernel: tpu_custom_call.1
= control target key start
LH: loop header
LB: loop body
LE: loop exit
PB: predicated region body
PF: predicated region fallthrough
CT: control target
= control target key end

     0   :  { %s2146_s0 = inlined_call_operand.hbm [shape: f32[2,8,32], index: 0, kind: input, shape index: {}]   ;;  %s2147_s1 = inlined_call_operand.vmem [shape: f32[32,32], index: 1, kind: input, shape index: {}]   ;;  %s2148_s2 = inlined_call_operand.vmem [shape: f32[1,32], index: 2, kind: input, shape index: {}]   ;;  %s2149_s3 = inlined_call_operand.vmem [shape: f32[32,32], index: 3, kind: input, shape index: {}]   ;;  %s2150_s4 = inlined_call_operand.vmem [shape: f32[1,32], index: 4, kind: input, shape index: {}]   ;;  %s2151_s5 = inlined_call_operand.vmem [shape: f32[32,32], index: 5, kind: input, shape index: {}]   ;;  %s2152_s6 = inlined_call_operand.vmem [shape: f32[1,32], index: 6, kind: input, shape index: {}]   ;;  %s2153_s7 = inlined_call_operand.hbm [shape: f32[32,32], index: 7, kind: input, shape index: {}]   ;;  %s2154_s8 = inlined_call_operand.vmem [shape: f32[1,32], index: 8, kind: input, shape index: {}]   ;;  %s2155_s9 = inlined_call_operand.vmem [shape: f32[1,32], index: 9, kind: input, shape index: {}]   ;;  %s2156_s10 = inlined_call_operand.vmem [shape: f32[1,32], index: 10, kind: input, shape index: {}]   ;;  %s2157_s11 = inlined_call_operand.hbm [shape: f32[32,64], index: 11, kind: input, shape index: {}]   ;;  %s2158_s12 = inlined_call_operand.vmem [shape: f32[1,64], index: 12, kind: input, shape index: {}]   ;;  %s2159_s13 = inlined_call_operand.vmem [shape: f32[64,32], index: 13, kind: input, shape index: {}]   ;;  %s2160_s14 = inlined_call_operand.vmem [shape: f32[1,32], index: 14, kind: input, shape index: {}]   ;;  %s2161_s15 = inlined_call_operand.vmem [shape: f32[1,32], index: 15, kind: input, shape index: {}]   ;;  %s2162_s16 = inlined_call_operand.vmem [shape: f32[1,32], index: 16, kind: input, shape index: {}]   ;;  %s2163_s17 = inlined_call_operand.hbm [shape: f32[2,8,32], index: 17, kind: output, shape index: {}]  }
   0x1   :  { %2169 = sst [smem:[#allocation17_spill]] %s2146_s0 }
   0x2   :  { %2170 = sst [smem:[#allocation18_spill]] %s2147_s1 }
   0x3   :  { %2171 = sst [smem:[#allocation19_spill]] %s2148_s2 }
   0x4   :  { %2172 = sst [smem:[#allocation20_spill]] %s2149_s3 }
   0x5   :  { %2173 = sst [smem:[#allocation21_spill]] %s2153_s7 }
   0x6   :  { %2174 = sst [smem:[#allocation22_spill]] %s2157_s11 }
   0x7   :  { %2175 = sst [smem:[#allocation23_spill]] %s2158_s12 }
   0x8   :  { %2176 = sst [smem:[#allocation24_spill]] %s2160_s14 }
   0x9   :  { %2177 = sst [smem:[#allocation25_spill]] %s2161_s15 }
   0xa   :  { %2178 = sst [smem:[#allocation26_spill]] %s2162_s16 }
   0xb   :  { %2179 = sst [smem:[#allocation27_spill]] %s2163_s17 }
   0xc   :  { %22 = vsyncpa [#allocation5], 0 }
   0xd   :  { %24 = vsyncpa [#allocation5 + $0x1], 0 }
   0xe   :  { %25 = vsyncpa [#allocation8], 0 }
   0xf   :  { %26 = vsyncpa [#allocation6], 0 }
  0x10   :  { %28 = vsyncpa [#allocation6 + $0x1], 0  ;;  %s1847_s24 = smov 0   ;;  %s1849_s25 = smov 0  }
  0x11   :  { %s1851_s26 = smov 0   ;;  %s1853_s27 = smov 0  }
  0x12   :  { %s1855_s28 = smov 0   ;;  %s1857_s29 = smov 0  }
  0x13 LB: > { %2180 = sst [smem:[#allocation14_spill]] %s1724_s24  ;;  %s2165_s0 = sadd.s32 4294967295, %s1744_s29   ;;  %s1744_s29 = sphi %s1857_s29, %s34_s29   ;;  %s1740_s28 = sphi %s1855_s28, %s2207_s28   ;;  %s1736_s27 = sphi %s1853_s27, %s2206_s27   ;;  %s1732_s26 = sphi %s1851_s26, %s2205_s26   ;;  %s1728_s25 = sphi %s1849_s25, %s2204_s25   ;;  %s1724_s24 = sphi %s1847_s24, %s2203_s24  }
  0x14   : > { %2181 = sst [smem:[#allocation15_spill]] %s1736_s27  ;;  %p1398_p0 = scmp.ge.s32.totalorder %s1744_s29, 1 }
  0x15   : > { %p1881_p1 = scmp.eq.s32.totalorder %s2165_s0, 0  ;;  %p441_p2 = scmp.lt.s32.totalorder %s1744_s29, 3 }
  0x16   : > { %s2183_s7 = sld [smem:[#allocation21_spill]]  ;;  %s1746_s21 = smov [#allocation7]  }
  0x17   : > { %p1889_p3 = pnand %p1398_p0, %p441_p2  ;;  %s472_s22 = sshll.u32 %s1746_s21, 4  ;;  %s473_s22 = int_to_ptr.vmem [resolvable:$true] %s472_s22 }
  0x18   : > { %p1401_p6 = scmp.ge.s32.totalorder %s1744_s29, 2  ;;  %s2185_s11 = sld [smem:[#allocation22_spill]] }
  0x19   : > { %p1444_p4 = pneg %p1889_p3  ;;  %s1747_s0 = smov 128  }
  0x1a   : > { %s1749_s21 = smov [#allocation9]   ;;  %s46_s17 = sadd.s32 1, %s1740_s28 }
  0x1b   : > { %p1445_p5 = pnand %p1444_p4, %p1881_p1  ;;  %s495_s16 = sshll.u32 %s1749_s21, 4  ;;  %s496_s16 = int_to_ptr.vmem [resolvable:$true] %s495_s16 }
  0x1c   : > { %s470_s1 = sshll.u32 %s2183_s7, 4  ;;  %s1748_s7 = smov 8   ;;  %s471_s1 = int_to_ptr.hbm [resolvable:$true] %s470_s1 }
  0x1d   : > { %1447 = dma.hbm_to_vmem [thread:$0]  (!%p1445_p5), %s471_s1, 512, %s473_s22, [#allocation8], %s1747_s0, %s1747_s0, %s1748_s7  }
  0x1e   : > { %s493_s19 = sshll.u32 %s2185_s11, 4  ;;  %s1397_s15 = sadd.s32 4294967294, %s1744_s29   ;;  %s494_s19 = int_to_ptr.hbm [resolvable:$true] %s493_s19 }
  0x1f   : > { %1450 = dma.hbm_to_vmem [thread:$0]  (!%p1445_p5), %s494_s19, 512, %s496_s16, [#allocation8], %s1747_s0, %s1747_s0, %s1748_s7  }
  0x20   : > { %p48_p7 = scmp.ge.s32.totalorder %s46_s17, 2  ;;  %s53_s23 = sadd.s32 1, %s1732_s26 }
  0x21   : > { %p60_p8 = scmp.ne.s32.totalorder %s1732_s26, %s1728_s25  ;;  %p61_p9 = scmp.eq.s32.totalorder %s1744_s29, 0 }
  0x22   : > { %s2209_s17 = smov (%p48_p7, %s46_s17), 0  ;;  %p66_p10 = scmp.ne.s32.totalorder %s1728_s25, %s1724_s24 }
  0x23   : > { %2186 = sst [smem:[#allocation16_spill]] %s2209_s17  ;;  %s50_s1 = ssub.s32 %s1740_s28, %s2209_s17 }
  0x24   : > { %s2187_s22 = sadd.s32 4294967295, %s1744_s29   ;;  %p51_p12 = scmp.eq.s32.totalorder %s50_s1, 0 }
  0x25   : > { %p428_p11 = scmp.eq.s32.totalorder %s2187_s22, 1  ;;  %p1917_p13 = por %p1881_p1, %p66_p10 }
  0x26   : > { %p434_p2 = scmp.eq.s32.totalorder %s1397_s15, 1  ;;  %p62_p4 = por %p61_p9, %p60_p8 }
  0x27   : > { %p1921_p0 = por %p428_p11, %p60_p8  ;;  %s524_s19 = sand.u32 1, %s1732_s26  }
  0x28   : > { %s1926_s0 = scalar_select %p51_p12, %s1732_s26, %s53_s23  }
  0x29   : > { %p1928_p5 = por %p434_p2, %p66_p10  ;;  %s1403_s21 = sshll.u32 %s1740_s28, 3 }
  0x2a   : > { %p1461_p7 = scmp.lt.s32.totalorder %s1744_s29, 2  ;;  %s1402_s1 = sshll.u32 %s524_s19, 3 }
  0x2b   : > { %s2191_s17 = sld [smem:[#allocation17_spill]]  ;;  %s528_s14 = scalar_lea.vmem [#allocation4], %s1402_s1 }
  0x2c   : > { %s536_s12 = sshll.u32 %s528_s14, 4  ;;  %p1452_p11 = pnand %p1461_p7, %p62_p4  ;;  %s537_s12 = int_to_ptr.vmem [resolvable:$true] %s536_s12 }
  0x2d   : > { %s525_s15 = scalar_lea.sflag [#allocation5], %s524_s19  ;;  %s1941_s23 = sand.u32 (!%p1889_p3), 1, %s1728_s25  }
  0x2e   : > { %s1405_s11 = sshll.u32 (!%p1889_p3), %s1941_s23, 3 }
  0x2f   : > { %545 = sbr.rel (%p1889_p3) target bundleno = 1816 (0x718), region = 88 }
  0x31   : > { %s532_s24 = scalar_lea.hbm %s2191_s17, %s1403_s21  ;;  %s548_s17 = scalar_lea.sflag (!%p1889_p3), [#allocation5], %s1941_s23 }
  0x32   : > { %s534_s27 = sshll.u32 %s532_s24, 4  ;;  %s551_s24 = scalar_lea.vmem (!%p1889_p3), [#allocation4], %s1405_s11  ;;  %s535_s27 = int_to_ptr.hbm [resolvable:$true] %s534_s27 }
  0x33   : > { %1454 = dma.hbm_to_vmem [thread:$0]  (!%p1452_p11), %s535_s27, 128, %s537_s12, %s525_s15  }
  0x34   : > { %1711 = dma.done.wait (%p1917_p13), %s548_s17, 128  }
  0x35   : > { %1713 = vsyncadd (%p1917_p13), %s548_s17, 4294967168 }
  0x36   : > { %1715 = dma.done.wait (%p1881_p1), [#allocation8], 1024  }
  0x37   : > { %1717 = vsyncadd (%p1881_p1), [#allocation8], 4294966272  ;;  %s2192_s3 = sld [smem:[#allocation20_spill]]  ;;  %v1979_v8 = vld [vmem:[%s551_s24] sm:$0xff]  ;;  %vm626_vm0 = vcmask 261120   ;;  %v653_v9 = vld [vmem:[%s2151_s5 + $0x18] sm:$0xff] }
  0x38   : > { %s2193_s19 = sld [smem:[#allocation18_spill]]  ;;  %v652_v10 = vld [vmem:[%s2151_s5 + $0x10] sm:$0xff]  ;;  %v651_v11 = vld [vmem:[%s2151_s5 + $0x8] sm:$0xff]  ;;  %v650_v12 = vld [vmem:[%s2151_s5] sm:$0xff]  ;;  %vm688_vm1 = vcmask 64512   ;;  %s1750_s20 = smov 112  }
  0x39   : > { %v1524_v13 = vld [vmem:[%s2150_s4] ss:$0 sm:$0xff]  ;;  %s1751_s21 = smov 120   ;;  %s2194_s2 = sld [smem:[#allocation19_spill]] }
  0x3a   : > { %s1752_s22 = smov 104   ;;  %v1526_v20 = vld [vmem:[%s2152_s6] ss:$0 sm:$0xff]  ;;  %s1753_s15 = smov 8  }
  0x3b   : > { %s1754_s17 = smov 16   ;;  %s1755_s12 = smov 24  }
  0x3c   : > { %s2197_s1 = sld [smem:[#allocation15_spill]] }
  0x3d   : > { %v621_v0 = vld [vmem:[%s2192_s3 + $0x18] sm:$0xff]  ;;  %v620_v2 = vld [vmem:[%s2192_s3 + $0x10] sm:$0xff]  ;;  %v619_v4 = vld [vmem:[%s2192_s3 + $0x8] sm:$0xff]  ;;  %s2198_s24 = sld [smem:[#allocation25_spill]] }
  0x3e   : > { %v713_v1 = vld [vmem:[%s2193_s19 + $0x18] sm:$0xff]  ;;  %642 = vmatpush.msra.mxu1 %v621_v0  ;;  %v712_v3 = vld [vmem:[%s2193_s19 + $0x10] sm:$0xff]  ;;  %v711_v5 = vld [vmem:[%s2193_s19 + $0x8] sm:$0xff] }
  0x3f   : > { %734 = vmatpush.msra.mxu2 %v713_v1  ;;  %v618_v6 = vld [vmem:[%s2192_s3] sm:$0xff] }
  0x40   : > { %v710_v7 = vld [vmem:[%s2193_s19] sm:$0xff]  ;;  %643 = vmatpush.msra.mxu1 %v620_v2 }
  0x41   : > { %735 = vmatpush.msra.mxu2 %v712_v3  ;;  %v1525_v16 = vld [vmem:[%s2194_s2] ss:$0 sm:$0xff] }
  0x42   : > { %644 = vmatpush.msra.mxu1 %v619_v4  ;;  %s1429_s7 = sshll.u32 %s2197_s1, 3  ;;  %s612_s1 = scalar_lea.vmem [#allocation10], %s1405_s11 }
  0x43   : > { %736 = vmatpush.msra.mxu2 %v711_v5  ;;  %s1293_s2 = sshll.u32 %s612_s1, 4  ;;  %s1294_s2 = int_to_ptr.vmem [resolvable:$true] %s1293_s2 }
  0x44   : > { %645 = vmatpush.msra.mxu1 %v618_v6 }
  0x45   : > { %737 = vmatpush.msra.mxu2 %v710_v7  ;;  %1409 = vmatmul.msk.f32.vlgmr.msra.gmra.mxu1 %vm626_vm0, %v1979_v8 }
  0x46   : > { %1411 = vmatmul.msk.f32.vlgmr.msra.gmra.mxu2 %vm626_vm0, %v1979_v8  ;;  %670 = vmatpush.msrb.mxu1 %v653_v9 }
  0x48   : > { %671 = vmatpush.msrb.mxu1 %v652_v10 }
  0x4a   : > { %672 = vmatpush.msrb.mxu1 %v651_v11 }
  0x4c   : > { %673 = vmatpush.msrb.mxu1 %v650_v12 }
  0x4d   : > { %1410 = vmatmul.msk.f32.vlgmr.msrb.gmra.mxu1 %vm626_vm0, %v1979_v8 }
  0xc2   : > { %v647_v14 = vpop.f32.mrf.mxu1 }
  0xc3   : > { %v648_v15 = vadd.f32 %v1524_v13, %v647_v14 }
  0xc5   : > { %689 = vst.msk [vmem:[#allocation2] sm:$0xff] %vm688_vm1, %v648_v15  ;;  %682 = vrot.lane.b32.xlu1 %v648_v15, %s1750_s20  ;;  %679 = vrot.lane.b32.xlu0 %v648_v15, %s1751_s21 }
  0xc9   : > { %v739_v17 = vpop.f32.mrf.mxu2 }
  0xca   : > { %v740_v18 = vadd.f32 %v1525_v16, %v739_v17  ;;  %v675_v23 = vpop.f32.mrf.mxu1 }
  0xcb   : > { %v676_v24 = vadd.f32 %v1526_v20, %v675_v23 }
  0xcc   : > { %745 = vrot.lane.b32.xlu2 %v740_v18, %s1750_s20  ;;  %v749_v19 = vld [vmem:[#allocation2] sm:$0xff] }
  0xcd   : > { %685 = vrot.lane.b32.xlu1 %v648_v15, %s1752_s22  ;;  %1412 = vmatpush.xpose.msk.msra.mxu3 %vm688_vm1, %v749_v19  ;;  %703 = vst.msk [vmem:[#allocation3] sm:$0xff] %vm688_vm1, %v676_v24 }
  0xce   : > { %743 = vrot.lane.b32.xlu0 %v740_v18, %s1751_s21 }
  0xd0   : > { %1413 = vmatmul.msk.f32.vlgmr.msra.gmra.mxu3 %vm688_vm1, %v740_v18 }
  0xd4   : > { %747 = vrot.lane.b32.xlu2 %v740_v18, %s1752_s22  ;;  %v753_v30 = vld [vmem:[#allocation3] sm:$0xff] }
  0xd5   : > { %694 = vrot.lane.b32.xlu1 %v676_v24, %s1751_s21  ;;  %932 = vmatpush.msrb.mxu2 %v753_v30  ;;  %s2196_s21 = sld [smem:[#allocation24_spill]] }
 0x126   : > { %v746_v27 = vpop.permute.xlu2 %745 }
 0x12e   : > { %v748_v32 = vpop.permute.xlu2 %747 }
 0x137   : > { %v683_v21 = vpop.permute.xlu1 %682  ;;  %v680_v22 = vpop.permute.xlu0 %679 }
 0x138   : > { %691 = vst.msk [vmem:[#allocation2 + $0x10] sm:$0xff] %vm688_vm1, %v683_v21 }
 0x139   : > { %690 = vst.msk [vmem:[#allocation2 + $0x8] sm:$0xff] %vm688_vm1, %v680_v22 }
 0x13f   : > { %v686_v25 = vpop.permute.xlu1 %685  ;;  %v751_v26 = vld [vmem:[#allocation2 + $0x10] sm:$0xff] }
 0x140   : > { %692 = vst.msk [vmem:[#allocation2 + $0x18] sm:$0xff] %vm688_vm1, %v686_v25  ;;  %v750_v28 = vld [vmem:[#allocation2 + $0x8] sm:$0xff]  ;;  %1416 = vmatpush.xpose.msk.msra.mxu0 %vm688_vm1, %v751_v26  ;;  %v744_v29 = vpop.permute.xlu0 %743 }
 0x141   : > { %1414 = vmatpush.xpose.msk.msrb.mxu3 %vm688_vm1, %v750_v28 }
 0x143   : > { %1417 = vmatmul.msk.f32.vlgmr.msra.gmra.mxu0 %vm688_vm1, %v746_v27 }
 0x144   : > { %1415 = vmatmul.msk.f32.vlgmr.msrb.gmra.mxu3 %vm688_vm1, %v744_v29 }
 0x147   : > { %v752_v31 = vld [vmem:[#allocation2 + $0x18] sm:$0xff]  ;;  %v695_v33 = vpop.permute.xlu1 %694 }
 0x148   : > { %1418 = vmatpush.xpose.msk.msra.mxu1 %vm688_vm1, %v752_v31  ;;  %704 = vst.msk [vmem:[#allocation3 + $0x8] sm:$0xff] %vm688_vm1, %v695_v33 }
 0x14b   : > { %1419 = vmatmul.msk.f32.vlgmr.msra.gmra.mxu1 %vm688_vm1, %v748_v32 }
 0x14f   : > { %v754_v37 = vld [vmem:[#allocation3 + $0x8] sm:$0xff] }
 0x150   : > { %955 = vmatpush.msra.mxu3 %v754_v37 }
 0x153   : > { %v780_v34 = vpop.f32.mrf.mxu3 }
 0x154   : > { %v858_v42 = vsel %vm688_vm1, %v780_v34, -inf }
 0x1c0   : > { %v830_v35 = vpop.f32.mrf.mxu0 }
 0x1c1   : > { %v864_v36 = vsel %vm688_vm1, %v830_v35, -inf }
 0x1c2   : > { %865 = vmax.xlane.f32.xlu2 %v864_v36 }
 0x1c7   : > { %v805_v38 = vpop.f32.mrf.mxu3 }
 0x1c8   : > { %v855_v39 = vpop.f32.mrf.mxu1  ;;  %v861_v40 = vsel %vm688_vm1, %v805_v38, -inf }
 0x1c9   : > { %862 = vmax.xlane.f32.xlu0 %v861_v40  ;;  %v867_v41 = vsel %vm688_vm1, %v855_v39, -inf }
 0x1ca   : > { %868 = vmax.xlane.f32.xlu1 %v867_v41 }
 0x1d2   : > { %859 = vmax.xlane.f32.xlu1 %v858_v42 }
 0x1da   : > { %697 = vrot.lane.b32.xlu2 %v676_v24, %s1750_s20 }
 0x1dd   : > { %700 = vrot.lane.b32.xlu0 %v676_v24, %s1752_s22  ;;  %s2195_s22 = sld [smem:[#allocation23_spill]] }
 0x235   : > { %v866_v43 = vpop.xlane.xlu2 %865 }
 0x236   : > { %v884_v44 = vsub.f32 %v830_v35, %v866_v43  ;;  %v872_v3 = vsub.f32 -inf, %v866_v43 }
 0x238   : > { %v890_v45 = vmul.f32 1.442695, %v884_v44  ;;  %v878_v4 = vmul.f32 1.442695, %v872_v3  ;;  %v1090_v3 = vld [vmem:[#allocation7 + $0x18] sm:$0xff] }
 0x239   : > { %1110 = vmatpush.msra.mxu2 %v1090_v3  ;;  %v1212_v3 = vld [vmem:[%s2159_s13 + $0x18] sm:$0xff] }
 0x23a   : > { %1534 = vpow2.f32 %v890_v45 }
 0x23c   : > { %v863_v46 = vpop.xlane.xlu0 %862 }
 0x23d   : > { %v883_v47 = vsub.f32 %v805_v38, %v863_v46  ;;  %v698_v48 = vpop.permute.xlu2 %697  ;;  %v869_v49 = vpop.xlane.xlu1 %868  ;;  %v871_v5 = vsub.f32 -inf, %v863_v46 }
 0x23e   : > { %705 = vst.msk [vmem:[#allocation3 + $0x10] sm:$0xff] %vm688_vm1, %v698_v48  ;;  %v885_v50 = vsub.f32 %v855_v39, %v869_v49  ;;  %v873_v6 = vsub.f32 -inf, %v869_v49 }
 0x23f   : > { %v888_v51 = vmul.f32 1.442695, %v883_v47  ;;  %v876_v7 = vmul.f32 1.442695, %v871_v5 }
 0x240   : > { %v892_v52 = vmul.f32 1.442695, %v885_v50  ;;  %v1535_v53 = vpop.eup %1534  ;;  %v880_v9 = vmul.f32 1.442695, %v873_v6  ;;  %v1088_v6 = vld [vmem:[#allocation7 + $0x8] sm:$0xff] }
 0x241   : > { %1536 = vpow2.f32 %v888_v51  ;;  %v904_v54 = vsel %vm688_vm1, %v1535_v53, 0.0 }
 0x242   : > { %905 = vadd.xlane.f32.xlu0 %v904_v54  ;;  %1538 = vpow2.f32 %v892_v52 }
 0x245   : > { %v2034_v55 = vpop.xlane.xlu1 %859  ;;  %v755_v56 = vld [vmem:[#allocation3 + $0x10] sm:$0xff] }
 0x246   : > { %v882_v57 = vsub.f32 %v780_v34, %v2034_v55  ;;  %978 = vmatpush.msrb.mxu0 %v755_v56 }
 0x247   : > { %1422 = vmatmul.msk.f32.vlgmr.msrb.gmra.mxu0 %vm688_vm1, %v1535_v53  ;;  %v1537_v58 = vpop.eup %1536 }
 0x248   : > { %v886_v59 = vmul.f32 1.442695, %v882_v57  ;;  %1421 = vmatmul.msk.f32.vlgmr.msra.gmra.mxu3 %vm688_vm1, %v1537_v58  ;;  %v901_v60 = vsel %vm688_vm1, %v1537_v58, 0.0  ;;  %v1539_v61 = vpop.eup %1538 }
 0x249   : > { %902 = vadd.xlane.f32.xlu1 %v901_v60  ;;  %v907_v62 = vsel %vm688_vm1, %v1539_v61, 0.0 }
 0x24a   : > { %1540 = vpow2.f32 %v886_v59  ;;  %908 = vadd.xlane.f32.xlu2 %v907_v62  ;;  %v870_v62 = vsub.f32 -inf, %v2034_v55 }
 0x24b   : > { %1542 = vpow2.f32 %v878_v4  ;;  %v1089_v4 = vld [vmem:[#allocation7 + $0x10] sm:$0xff] }
 0x24c   : > { %1544 = vpow2.f32 %v876_v7  ;;  %1111 = vmatpush.msra.mxu2 %v1089_v4  ;;  %v1087_v7 = vld [vmem:[#allocation7] sm:$0xff]  ;;  %v1530_v4 = vld [vmem:[%s2195_s22] ss:$0 sm:$0xff]  ;;  %s1280_s22 = scalar_lea.sflag [#allocation6], %s1941_s23 }
 0x24d   : > { %1546 = vpow2.f32 %v880_v9 }
 0x24e   : > { %1112 = vmatpush.msra.mxu2 %v1088_v6  ;;  %v1210_v6 = vld [vmem:[%s2159_s13 + $0x8] sm:$0xff] }
 0x24f   : > { %v701_v63 = vpop.permute.xlu0 %700 }
 0x250   : > { %706 = vst.msk [vmem:[#allocation3 + $0x18] sm:$0xff] %vm688_vm1, %v701_v63  ;;  %v1541_v0 = vpop.eup %1540  ;;  %v874_v63 = vmul.f32 1.442695, %v870_v62  ;;  %1113 = vmatpush.msra.mxu2 %v1087_v7  ;;  %v1209_v7 = vld [vmem:[%s2159_s13] sm:$0xff] }
 0x251   : > { %1420 = vmatmul.msk.f32.vlgmr.msrb.gmra.mxu2 %vm688_vm1, %v1541_v0  ;;  %v898_v1 = vsel %vm688_vm1, %v1541_v0, 0.0  ;;  %v1543_v10 = vpop.eup %1542 }
 0x252   : > { %899 = vadd.xlane.f32.xlu1 %v898_v1  ;;  %v896_v11 = vmul.f32 0.0, %v1543_v10  ;;  %v1545_v14 = vpop.eup %1544 }
 0x253   : > { %v1547_v15 = vpop.eup %1546  ;;  %v895_v16 = vmul.f32 0.0, %v1545_v14 }
 0x254   : > { %v897_v19 = vmul.f32 0.0, %v1547_v15 }
 0x257   : > { %v756_v2 = vld [vmem:[#allocation3 + $0x18] sm:$0xff] }
 0x258   : > { %1001 = vmatpush.msrb.mxu1 %v756_v2 }
 0x259   : > { %1423 = vmatmul.msk.f32.vlgmr.msrb.gmra.mxu1 %vm688_vm1, %v1539_v61 }
 0x2b5   : > { %v906_v12 = vpop.xlane.xlu0 %905 }
 0x2b6   : > { %v912_v13 = vadd.f32 %v906_v12, %v896_v11 }
 0x2b8   : > { %1548 = vrcp.f32 %v912_v13  ;;  %vm1043_vm7 = vweird.f32 %v912_v13  ;;  %v1049_v42 = vand.u32 2147483648, %v912_v13  ;;  %v1047_v44 = vand.u32 2147483647, %v912_v13 }
 0x2ba   : > { %v1050_v51 = vor.u32 1.1754944e-38, %v1049_v42  ;;  %vm1048_vm12 = vcmp.eq.f32.partialorder %v1047_v44, 8.507059e+37  ;;  %v1160_v44 = vld [vmem:[#allocation9 + $0x10] sm:$0xff] }
 0x2bc   : > { %v903_v17 = vpop.xlane.xlu1 %902 }
 0x2bd   : > { %v911_v18 = vadd.f32 %v903_v17, %v895_v16  ;;  %v909_v20 = vpop.xlane.xlu2 %908 }
 0x2be   : > { %v1549_v21 = vpop.eup %1548  ;;  %v913_v22 = vadd.f32 %v909_v20, %v897_v19 }
 0x2bf   : > { %1550 = vrcp.f32 %v911_v18  ;;  %v1039_v23 = vmul.f32 %v1549_v21, %v912_v13  ;;  %v1033_v30 = vand.u32 2147483647, %v911_v18  ;;  %v1035_v31 = vand.u32 2147483648, %v911_v18 }
 0x2c0   : > { %1552 = vrcp.f32 %v913_v22  ;;  %vm1029_vm3 = vweird.f32 %v911_v18  ;;  %vm1044_vm4 = vweird.f32 %v1549_v21  ;;  %v1063_v47 = vand.u32 2147483648, %v913_v22 }
 0x2c1   : > { %v1040_v25 = vsub.f32 1.0, %v1039_v23  ;;  %v1036_v38 = vor.u32 1.1754944e-38, %v1035_v31  ;;  %vm1034_vm6 = vcmp.eq.f32.partialorder %v1033_v30, 8.507059e+37  ;;  %vm1045_vm9 = vmor %vm1043_vm7, %vm1044_vm4  ;;  %vm1057_vm10 = vweird.f32 %v913_v22 }
 0x2c2   : > { %v1061_v49 = vand.u32 2147483647, %v913_v22  ;;  %v1064_v56 = vor.u32 1.1754944e-38, %v1063_v47  ;;  %1554 = vpow2.f32 %v874_v63  ;;  %vm1083_vm4 = vcmask 130048   ;;  %v1216_v63 = vld [vmem:[%s2159_s13 + $0x38] sm:$0xff] }
 0x2c3   : > { %v1041_v33 = vmul.f32 %v1549_v21, %v1040_v25  ;;  %1233 = vmatpush.msra.mxu0 %v1216_v63 }
 0x2c4   : > { %v980_v50 = vpop.f32.mrf.mxu0  ;;  %vm1062_vm13 = vcmp.eq.f32.partialorder %v1061_v49, 8.507059e+37 }
 0x2c5   : > { %v1551_v24 = vpop.eup %1550  ;;  %v1042_v39 = vadd.f32 %v1549_v21, %v1041_v33  ;;  %v1008_v57 = vadd.f32 %v980_v50, %v896_v11  ;;  %v900_v1 = vpop.xlane.xlu1 %899 }
 0x2c6   : > { %v1025_v26 = vmul.f32 %v1551_v24, %v911_v18  ;;  %v1553_v27 = vpop.eup %1552  ;;  %vm1030_vm2 = vweird.f32 %v1551_v24 }
 0x2c7   : > { %v1053_v29 = vmul.f32 %v1553_v27, %v913_v22  ;;  %vm1031_vm5 = vmor %vm1029_vm3, %vm1030_vm2  ;;  %vm1058_vm8 = vweird.f32 %v1553_v27  ;;  %v1046_v48 = vsel %vm1045_vm9, %v1549_v21, %v1042_v39 }
 0x2c8   : > { %v1026_v28 = vsub.f32 1.0, %v1025_v26  ;;  %vm1059_vm11 = vmor %vm1057_vm10, %vm1058_vm8  ;;  %v1051_v53 = vsel %vm1048_vm12, %v1050_v51, %v1046_v48  ;;  %v1555_v0 = vpop.eup %1554 }
 0x2c9   : > { %v1054_v32 = vsub.f32 1.0, %v1053_v29  ;;  %v1068_v60 = vmul.f32 %v1051_v53, %v1008_v57  ;;  %v894_v2 = vmul.f32 0.0, %v1555_v0  ;;  %v1528_v57 = vld [vmem:[%s2155_s9] ss:$0 sm:$0xff]  ;;  %v1215_v0 = vld [vmem:[%s2159_s13 + $0x30] sm:$0xff] }
 0x2ca   : > { %v1027_v34 = vmul.f32 %v1551_v24, %v1026_v28  ;;  %1234 = vmatpush.msra.mxu0 %v1215_v0 }
 0x2cb   : > { %v957_v35 = vpop.f32.mrf.mxu3  ;;  %v1055_v37 = vmul.f32 %v1553_v27, %v1054_v32  ;;  %v910_v5 = vadd.f32 %v900_v1, %v894_v2  ;;  %v1756_v32 = vmov 32.0   ;;  %v1214_v1 = vld [vmem:[%s2159_s13 + $0x28] sm:$0xff] }
 0x2cc   : > { %v1028_v36 = vadd.f32 %v1551_v24, %v1027_v34  ;;  %v1007_v40 = vadd.f32 %v957_v35, %v895_v16  ;;  %1235 = vmatpush.msra.mxu0 %v1214_v1 }
 0x2cd   : > { %v1056_v46 = vadd.f32 %v1553_v27, %v1055_v37  ;;  %1556 = vrcp.f32 %v910_v5  ;;  %v1021_v13 = vand.u32 2147483648, %v910_v5  ;;  %vm1015_vm15 = vweird.f32 %v910_v5 }
 0x2ce   : > { %v1032_v41 = vsel %vm1031_vm5, %v1551_v24, %v1028_v36  ;;  %v1019_v14 = vand.u32 2147483647, %v910_v5  ;;  %vm1085_vm5 = vcmask 195584   ;;  %1558 = vrcp.f32 %v1756_v32 }
 0x2cf   : > { %v1037_v43 = vsel %vm1034_vm6, %v1036_v38, %v1032_v41  ;;  %v1060_v52 = vsel %vm1059_vm11, %v1553_v27, %v1056_v46  ;;  %v1022_v18 = vor.u32 1.1754944e-38, %v1021_v13  ;;  %v1527_v27 = vld [vmem:[%s2154_s8] ss:$0 sm:$0xff]  ;;  %v1158_v46 = vld [vmem:[#allocation9] sm:$0xff] }
 0x2d0   : > { %v1067_v45 = vmul.f32 %v1037_v43, %v1007_v40  ;;  %v1065_v59 = vsel %vm1062_vm13, %v1064_v56, %v1060_v52  ;;  %vm1020_vm3 = vcmp.eq.f32.partialorder %v1019_v14, 8.507059e+37  ;;  %v1161_v43 = vld [vmem:[#allocation9 + $0x18] sm:$0xff]  ;;  %vm1221_vm13 = vcmask 523264  }
 0x2d1   : > { %1181 = vmatpush.msrb.mxu3 %v1161_v43  ;;  %v1532_v43 = vld [vmem:[%s2198_s24] ss:$0 sm:$0xff] }
 0x2d2   : > { %1071 = vrot.lane.b32.xlu1 %v1067_v45, %s1753_s15  ;;  %v1159_v45 = vld [vmem:[#allocation9 + $0x8] sm:$0xff] }
 0x2d3   : > { %v1557_v9 = vpop.eup %1556  ;;  %1182 = vmatpush.msrb.mxu3 %v1160_v44 }
 0x2d4   : > { %v1011_v10 = vmul.f32 %v1557_v9, %v910_v5  ;;  %vm1016_vm14 = vweird.f32 %v1557_v9  ;;  %v934_v17 = vpop.f32.mrf.mxu2  ;;  %v1559_v33 = vpop.eup %1558  ;;  %v1211_v5 = vld [vmem:[%s2159_s13 + $0x10] sm:$0xff] }
 0x2d5   : > { %vm1017_vm2 = vmor %vm1015_vm15, %vm1016_vm14  ;;  %v1006_v20 = vadd.f32 %v934_v17, %v894_v2  ;;  %v1123_v34 = vmul.f32 32.0, %v1559_v33  ;;  %1183 = vmatpush.msrb.mxu3 %v1159_v45  ;;  %v1213_v2 = vld [vmem:[%s2159_s13 + $0x20] sm:$0xff] }
 0x2d6   : > { %v1003_v54 = vpop.f32.mrf.mxu1  ;;  %v1012_v11 = vsub.f32 1.0, %v1011_v10  ;;  %1236 = vmatpush.msra.mxu0 %v1213_v2 }
 0x2d7   : > { %v1009_v58 = vadd.f32 %v1003_v54, %v897_v19  ;;  %v1124_v35 = vsub.f32 1.0, %v1123_v34  ;;  %1184 = vmatpush.msrb.mxu3 %v1158_v46 }
 0x2d8   : > { %v1013_v12 = vmul.f32 %v1557_v9, %v1012_v11  ;;  %1237 = vmatpush.msra.mxu0 %v1212_v3 }
 0x2d9   : > { %v1069_v61 = vmul.f32 %v1065_v59, %v1009_v58  ;;  %v1125_v36 = vmul.f32 %v1559_v33, %v1124_v35 }
 0x2da   : > { %1075 = vrot.lane.b32.xlu1 %v1068_v60, %s1754_s17  ;;  %v1014_v55 = vadd.f32 %v1557_v9, %v1013_v12  ;;  %v1529_v60 = vld [vmem:[%s2156_s10] ss:$0 sm:$0xff]  ;;  %1238 = vmatpush.msra.mxu0 %v1211_v5 }
 0x2db   : > { %1079 = vrot.lane.b32.xlu0 %v1069_v61, %s1755_s12  ;;  %v1126_v37 = vadd.f32 %v1559_v33, %v1125_v36  ;;  %s2199_s12 = sld [smem:[#allocation27_spill]] }
 0x2dc   : > { %v1018_v15 = vsel %vm1017_vm2, %v1557_v9, %v1014_v55  ;;  %1239 = vmatpush.msra.mxu0 %v1210_v6 }
 0x2dd   : > { %v1023_v19 = vsel %vm1020_vm3, %v1022_v18, %v1018_v15 }
 0x2de   : > { %v1066_v21 = vmul.f32 %v1023_v19, %v1006_v20  ;;  %1240 = vmatpush.msra.mxu0 %v1209_v7 }
 0x2e1   : > { %s1291_s14 = scalar_lea.hbm %s2199_s12, %s1429_s7  ;;  %s1678_s11 = scalar_lea.hbm %s2199_s12, 16 }
 0x2e2   : > { %s1295_s3 = sshll.u32 %s1291_s14, 4  ;;  %s1296_s3 = int_to_ptr.hbm [resolvable:$true] %s1295_s3 }
 0x2e3   : > { %s1672_s30 = sshra.s32 %s1296_s3, 4  ;;  %s1673_s30 = int_to_ptr.hbm [resolvable:$true] %s1672_s30 }
 0x2e4   : > { %s1674_s7 = scalar_lea.hbm %s1673_s30, 8  ;;  %p1679_p9 = scmp.lt.s32.totalorder %s1673_s30, %s2199_s12 }
 0x2e5   : > { %p1675_p1 = scmp.ne.s32.totalorder %s1673_s30, %s1674_s7  ;;  %p1680_p10 = scmp.lt.s32.totalorder %s1678_s11, %s1674_s7 }
 0x2e7   : > { %p1676_p3 = pnand %p1675_p1, %p1921_p0  ;;  %p1681_p12 = por %p1680_p10, %p1679_p9 }
 0x2e9   : > { %p1677_p8 = pneg %p1676_p3 }
 0x2eb   : > { %p1682_p13 = pnand %p1681_p12, %p1677_p8 }
 0x344   : > { %v1072_v16 = vpop.permute.xlu1 %1071 }
 0x345   : > { %v1082_v22 = vsel %vm688_vm1, %v1066_v21, %v1072_v16  ;;  %vm1127_vm1 = vweird.f32 %v1559_v33 }
 0x346   : > { %v2053_v38 = vsel %vm1127_vm1, %v1559_v33, %v1126_v37 }
 0x34c   : > { %v1076_v23 = vpop.permute.xlu1 %1075 }
 0x34d   : > { %v1080_v24 = vpop.permute.xlu0 %1079  ;;  %v1084_v25 = vsel %vm1083_vm4, %v1082_v22, %v1076_v23 }
 0x34e   : > { %v1086_v26 = vsel %vm1085_vm5, %v1084_v25, %v1080_v24  ;;  %v1531_v24 = vld [vmem:[%s2196_s21] ss:$0 sm:$0xff]  ;;  %s2200_s21 = sld [smem:[#allocation26_spill]] }
 0x34f   : > { %1424 = vmatmul.msk.f32.vlgmr.msra.gmra.mxu2 %vm626_vm0, %v1086_v26 }
 0x354   : > { %v1533_v45 = vld [vmem:[%s2200_s21] ss:$0 sm:$0xff] }
 0x3d2   : > { %v1115_v28 = vpop.f32.mrf.mxu2 }
 0x3d3   : > { %v1116_v29 = vadd.f32 %v1527_v27, %v1115_v28 }
 0x3d5   : > { %v1118_v30 = vadd.f32 %v1116_v29, %v1979_v8 }
 0x3d7   : > { %v1119_v31 = vsel %vm626_vm0, %v1118_v30, 0.0 }
 0x3d8   : > { %1120 = vadd.xlane.f32.xlu2 %v1119_v31 }
 0x44b   : > { %v1121_v39 = vpop.xlane.xlu2 %1120 }
 0x44c   : > { %v1129_v40 = vmul.f32 %v2053_v38, %v1121_v39 }
 0x44e   : > { %v1130_v41 = vsub.f32 %v1118_v30, %v1129_v40 }
 0x450   : > { %v1131_v42 = vmul.f32 %v1130_v41, %v1130_v41 }
 0x452   : > { %v1132_v8 = vsel %vm626_vm0, %v1131_v42, 0.0 }
 0x453   : > { %1133 = vadd.xlane.f32.xlu1 %v1132_v8 }
 0x4c6   : > { %v1134_v47 = vpop.xlane.xlu1 %1133 }
 0x4c7   : > { %v1135_v48 = vmul.f32 %v1134_v47, %v2053_v38 }
 0x4c9   : > { %v1136_v49 = vadd.f32 1e-05, %v1135_v48 }
 0x4cb   : > { %1560 = vrsqrt.f32 %v1136_v49  ;;  %vm1143_vm7 = vweird.f32 %v1136_v49 }
 0x4d1   : > { %v1561_v50 = vpop.eup %1560 }
 0x4d2   : > { %v1138_v51 = vmul.f32 %v1561_v50, %v1136_v49  ;;  %vm1144_vm6 = vweird.f32 %v1561_v50 }
 0x4d3   : > { %vm1145_vm8 = vmor %vm1143_vm7, %vm1144_vm6 }
 0x4d4   : > { %v1139_v52 = vmul.f32 %v1561_v50, %v1138_v51 }
 0x4d6   : > { %v1140_v53 = vmul.f32 0.5, %v1139_v52 }
 0x4d8   : > { %v1141_v54 = vsub.f32 1.5, %v1140_v53 }
 0x4da   : > { %v1142_v56 = vmul.f32 %v1561_v50, %v1141_v54 }
 0x4dc   : > { %v1146_v58 = vsel %vm1145_vm8, %v1561_v50, %v1142_v56 }
 0x4dd   : > { %v1147_v59 = vmul.f32 %v1146_v58, %v1130_v41 }
 0x4df   : > { %v1152_v61 = vmul.f32 %v1528_v57, %v1147_v59 }
 0x4e1   : > { %v1157_v62 = vadd.f32 %v1529_v60, %v1152_v61 }
 0x4e3   : > { %1425 = vmatmul.msk.f32.vlgmr.msrb.gmra.mxu3 %vm626_vm0, %v1157_v62 }
 0x566   : > { %v1186_v9 = vpop.f32.mrf.mxu3 }
 0x567   : > { %v1187_v10 = vadd.f32 %v1530_v4, %v1186_v9 }
 0x569   : > { %v1426_v11 = vmul.f32 -1.442695, %v1187_v10 }
 0x56b   : > { %1562 = vpow2.f32 %v1426_v11 }
 0x571   : > { %v1563_v12 = vpop.eup %1562 }
 0x572   : > { %v1192_v55 = vadd.f32 1.0, %v1563_v12 }
 0x574   : > { %1564 = vrcp.f32 %v1192_v55  ;;  %v1204_v16 = vand.u32 2147483648, %v1192_v55  ;;  %v1202_v18 = vand.u32 2147483647, %v1192_v55  ;;  %vm1198_vm10 = vweird.f32 %v1192_v55 }
 0x576   : > { %v1205_v20 = vor.u32 1.1754944e-38, %v1204_v16  ;;  %vm1203_vm12 = vcmp.eq.f32.partialorder %v1202_v18, 8.507059e+37 }
 0x57a   : > { %v1565_v13 = vpop.eup %1564 }
 0x57b   : > { %v1194_v14 = vmul.f32 %v1565_v13, %v1192_v55  ;;  %vm1199_vm9 = vweird.f32 %v1565_v13 }
 0x57c   : > { %vm1200_vm11 = vmor %vm1198_vm10, %vm1199_vm9 }
 0x57d   : > { %v1195_v15 = vsub.f32 1.0, %v1194_v14 }
 0x57f   : > { %v1196_v17 = vmul.f32 %v1565_v13, %v1195_v15 }
 0x581   : > { %v1197_v19 = vadd.f32 %v1565_v13, %v1196_v17 }
 0x583   : > { %v1201_v21 = vsel %vm1200_vm11, %v1565_v13, %v1197_v19 }
 0x584   : > { %v1206_v22 = vsel %vm1203_vm12, %v1205_v20, %v1201_v21 }
 0x585   : > { %v1208_v23 = vmul.f32 %v1206_v22, %v1187_v10 }
 0x587   : > { %1427 = vmatmul.msk.f32.vlgmr.msra.gmra.mxu0 %vm1221_vm13, %v1208_v23 }
 0x604   : > { %v1242_v25 = vpop.f32.mrf.mxu0 }
 0x605   : > { %v1243_v26 = vadd.f32 %v1531_v24, %v1242_v25 }
 0x607   : > { %v1245_v27 = vadd.f32 %v1243_v26, %v1157_v62 }
 0x609   : > { %v1246_v28 = vsel %vm626_vm0, %v1245_v27, 0.0 }
 0x60a   : > { %1247 = vadd.xlane.f32.xlu2 %v1246_v28 }
 0x67d   : > { %v1248_v29 = vpop.xlane.xlu2 %1247 }
 0x67e   : > { %v1249_v30 = vmul.f32 %v1248_v29, %v2053_v38 }
 0x680   : > { %v1250_v31 = vsub.f32 %v1245_v27, %v1249_v30 }
 0x682   : > { %v1251_v32 = vmul.f32 %v1250_v31, %v1250_v31 }
 0x684   : > { %v1252_v33 = vsel %vm626_vm0, %v1251_v32, 0.0 }
 0x685   : > { %1253 = vadd.xlane.f32.xlu2 %v1252_v33 }
 0x6f8   : > { %v1254_v34 = vpop.xlane.xlu2 %1253 }
 0x6f9   : > { %v1255_v35 = vmul.f32 %v1254_v34, %v2053_v38 }
 0x6fb   : > { %v1256_v36 = vadd.f32 1e-05, %v1255_v35 }
 0x6fd   : > { %1566 = vrsqrt.f32 %v1256_v36  ;;  %vm1263_vm15 = vweird.f32 %v1256_v36 }
 0x703   : > { %v1567_v37 = vpop.eup %1566 }
 0x704   : > { %v1258_v39 = vmul.f32 %v1567_v37, %v1256_v36  ;;  %vm1264_vm14 = vweird.f32 %v1567_v37 }
 0x705   : > { %vm1265_vm2 = vmor %vm1263_vm15, %vm1264_vm14 }
 0x706   : > { %v1259_v40 = vmul.f32 %v1567_v37, %v1258_v39 }
 0x708   : > { %v1260_v41 = vmul.f32 0.5, %v1259_v40 }
 0x70a   : > { %v1261_v42 = vsub.f32 1.5, %v1260_v41 }
 0x70c   : > { %v1262_v8 = vmul.f32 %v1567_v37, %v1261_v42 }
 0x70e   : > { %v1266_v38 = vsel %vm1265_vm2, %v1567_v37, %v1262_v8 }
 0x70f   : > { %v1267_v44 = vmul.f32 %v1266_v38, %v1250_v31 }
 0x711   : > { %v1272_v46 = vmul.f32 %v1532_v43, %v1267_v44 }
 0x713   : > { %v1277_v47 = vadd.f32 %v1533_v45, %v1272_v46 }
 0x715   : > { %1278 = vst.msk [vmem:[%s612_s1] sm:$0xff] %vm626_vm0, %v1277_v47 }
 0x716   : > { %1685 = shalt.err (!%p1682_p13)
}
 0x717   : > { %1442 = dma.vmem_to_hbm [thread:$0]  (%p1921_p0), %s1294_s2, 128, %s1296_s3, %s1280_s22  }
 0x718 PF: > { %s2201_s23 = sld [smem:[#allocation14_spill]]  ;;  %p1456_p2 = pnand %p1401_p6, %p1928_p5 }
 0x71a   : > { %p1457_p4 = pneg %p1456_p2 }
 0x71e   : > { %s1307_s27 = sand.u32 1, %s2201_s23  }
 0x71f   : > { %s1308_s20 = scalar_lea.sflag [#allocation6], %s1307_s27 }
 0x720   : > { %1719 = dma.done.wait (%p1457_p4), %s1308_s20, 128  }
 0x721   : > { %1721 = vsyncadd (%p1457_p4), %s1308_s20, 4294967168  ;;  %s34_s29 = sadd.s32 1, %s1744_s29   ;;  %s2202_s2 = sld [smem:[#allocation16_spill]] }
 0x722   : > { %p31_p7 = scmp.ge.s32.totalorder %s34_s29, 4   ;;  %s2203_s24 = smov %s1728_s25 }
 0x723   : > { %s2204_s25 = smov %s1732_s26  ;;  %s2205_s26 = smov %s1926_s0 }
 0x724   : > { %s2206_s27 = smov %s1740_s28  ;;  %33 = sbr.rel (!%p31_p7) target bundleno = 19 (0x13), region = 146 }
 0x727   : > { %s2207_s28 = smov %s2202_s2 }
 0x729   :  { %1314 = vsyncpa [#allocation5], 1 }
 0x72a   :  { %1316 = vsyncpa [#allocation5 + $0x1], 1 }
 0x72b   :  { %1317 = vsyncpa [#allocation8], 1 }
 0x72c   :  { %1318 = vsyncpa [#allocation6], 1 }
 0x72d   :  { %1320 = vsyncpa [#allocation6 + $0x1], 1 }

// kernel: tpu_custom_call.1
= control target key start
LH: loop header
LB: loop body
LE: loop exit
PB: predicated region body
PF: predicated region fallthrough
CT: control target
= control target key end

     0   :  { %s2146_s0 = inlined_call_operand.hbm [shape: f32[2,8,32], index: 0, kind: input, shape index: {}]   ;;  %s2147_s1 = inlined_call_operand.vmem [shape: f32[32,32], index: 1, kind: input, shape index: {}]   ;;  %s2148_s2 = inlined_call_operand.vmem [shape: f32[1,32], index: 2, kind: input, shape index: {}]   ;;  %s2149_s3 = inlined_call_operand.vmem [shape: f32[32,32], index: 3, kind: input, shape index: {}]   ;;  %s2150_s4 = inlined_call_operand.vmem [shape: f32[1,32], index: 4, kind: input, shape index: {}]   ;;  %s2151_s5 = inlined_call_operand.vmem [shape: f32[32,32], index: 5, kind: input, shape index: {}]   ;;  %s2152_s6 = inlined_call_operand.vmem [shape: f32[1,32], index: 6, kind: input, shape index: {}]   ;;  %s2153_s7 = inlined_call_operand.hbm [shape: f32[32,32], index: 7, kind: input, shape index: {}]   ;;  %s2154_s8 = inlined_call_operand.vmem [shape: f32[1,32], index: 8, kind: input, shape index: {}]   ;;  %s2155_s9 = inlined_call_operand.vmem [shape: f32[1,32], index: 9, kind: input, shape index: {}]   ;;  %s2156_s10 = inlined_call_operand.vmem [shape: f32[1,32], index: 10, kind: input, shape index: {}]   ;;  %s2157_s11 = inlined_call_operand.hbm [shape: f32[32,64], index: 11, kind: input, shape index: {}]   ;;  %s2158_s12 = inlined_call_operand.vmem [shape: f32[1,64], index: 12, kind: input, shape index: {}]   ;;  %s2159_s13 = inlined_call_operand.vmem [shape: f32[64,32], index: 13, kind: input, shape index: {}]   ;;  %s2160_s14 = inlined_call_operand.vmem [shape: f32[1,32], index: 14, kind: input, shape index: {}]   ;;  %s2161_s15 = inlined_call_operand.vmem [shape: f32[1,32], index: 15, kind: input, shape index: {}]   ;;  %s2162_s16 = inlined_call_operand.vmem [shape: f32[1,32], index: 16, kind: input, shape index: {}]   ;;  %s2163_s17 = inlined_call_operand.hbm [shape: f32[2,8,32], index: 17, kind: output, shape index: {}]  }
   0x1   :  { %2169 = sst [smem:[#allocation17_spill]] %s2146_s0 }
   0x2   :  { %2170 = sst [smem:[#allocation18_spill]] %s2147_s1 }
   0x3   :  { %2171 = sst [smem:[#allocation19_spill]] %s2148_s2 }
   0x4   :  { %2172 = sst [smem:[#allocation20_spill]] %s2149_s3 }
   0x5   :  { %2173 = sst [smem:[#allocation21_spill]] %s2153_s7 }
   0x6   :  { %2174 = sst [smem:[#allocation22_spill]] %s2157_s11 }
   0x7   :  { %2175 = sst [smem:[#allocation23_spill]] %s2158_s12 }
   0x8   :  { %2176 = sst [smem:[#allocation24_spill]] %s2160_s14 }
   0x9   :  { %2177 = sst [smem:[#allocation25_spill]] %s2161_s15 }
   0xa   :  { %2178 = sst [smem:[#allocation26_spill]] %s2162_s16 }
   0xb   :  { %2179 = sst [smem:[#allocation27_spill]] %s2163_s17 }
   0xc   :  { %22 = vsyncpa [#allocation5], 0 }
   0xd   :  { %24 = vsyncpa [#allocation5 + $0x1], 0 }
   0xe   :  { %25 = vsyncpa [#allocation8], 0 }
   0xf   :  { %26 = vsyncpa [#allocation6], 0 }
  0x10   :  { %28 = vsyncpa [#allocation6 + $0x1], 0  ;;  %s1847_s24 = smov 0   ;;  %s1849_s25 = smov 0  }
  0x11   :  { %s1851_s26 = smov 0   ;;  %s1853_s27 = smov 0  }
  0x12   :  { %s1855_s28 = smov 0   ;;  %s1857_s29 = smov 0  }
  0x13 LB: > { %2180 = sst [smem:[#allocation14_spill]] %s1724_s24  ;;  %s2165_s0 = sadd.s32 4294967295, %s1744_s29   ;;  %s1744_s29 = sphi %s1857_s29, %s34_s29   ;;  %s1740_s28 = sphi %s1855_s28, %s2207_s28   ;;  %s1736_s27 = sphi %s1853_s27, %s2206_s27   ;;  %s1732_s26 = sphi %s1851_s26, %s2205_s26   ;;  %s1728_s25 = sphi %s1849_s25, %s2204_s25   ;;  %s1724_s24 = sphi %s1847_s24, %s2203_s24  }
  0x14   : > { %2181 = sst [smem:[#allocation15_spill]] %s1736_s27  ;;  %p1398_p0 = scmp.ge.s32.totalorder %s1744_s29, 1 }
  0x15   : > { %p1881_p1 = scmp.eq.s32.totalorder %s2165_s0, 0  ;;  %p441_p2 = scmp.lt.s32.totalorder %s1744_s29, 3 }
  0x16   : > { %s2183_s7 = sld [smem:[#allocation21_spill]]  ;;  %s1746_s21 = smov [#allocation7]  }
  0x17   : > { %p1889_p3 = pnand %p1398_p0, %p441_p2  ;;  %s472_s22 = sshll.u32 %s1746_s21, 4  ;;  %s473_s22 = int_to_ptr.vmem [resolvable:$true] %s472_s22 }
  0x18   : > { %p1401_p6 = scmp.ge.s32.totalorder %s1744_s29, 2  ;;  %s2185_s11 = sld [smem:[#allocation22_spill]] }
  0x19   : > { %p1444_p4 = pneg %p1889_p3  ;;  %s1747_s0 = smov 128  }
  0x1a   : > { %s1749_s21 = smov [#allocation9]   ;;  %s46_s17 = sadd.s32 1, %s1740_s28 }
  0x1b   : > { %p1445_p5 = pnand %p1444_p4, %p1881_p1  ;;  %s495_s16 = sshll.u32 %s1749_s21, 4  ;;  %s496_s16 = int_to_ptr.vmem [resolvable:$true] %s495_s16 }
  0x1c   : > { %s470_s1 = sshll.u32 %s2183_s7, 4  ;;  %s1748_s7 = smov 8   ;;  %s471_s1 = int_to_ptr.hbm [resolvable:$true] %s470_s1 }
  0x1d   : > { %1447 = dma.hbm_to_vmem [thread:$0]  (!%p1445_p5), %s471_s1, 512, %s473_s22, [#allocation8], %s1747_s0, %s1747_s0, %s1748_s7  }
  0x1e   : > { %s493_s19 = sshll.u32 %s2185_s11, 4  ;;  %s1397_s15 = sadd.s32 4294967294, %s1744_s29   ;;  %s494_s19 = int_to_ptr.hbm [resolvable:$true] %s493_s19 }
  0x1f   : > { %1450 = dma.hbm_to_vmem [thread:$0]  (!%p1445_p5), %s494_s19, 512, %s496_s16, [#allocation8], %s1747_s0, %s1747_s0, %s1748_s7  }
  0x20   : > { %p48_p7 = scmp.ge.s32.totalorder %s46_s17, 2  ;;  %s53_s23 = sadd.s32 1, %s1732_s26 }
  0x21   : > { %p60_p8 = scmp.ne.s32.totalorder %s1732_s26, %s1728_s25  ;;  %p61_p9 = scmp.eq.s32.totalorder %s1744_s29, 0 }
  0x22   : > { %s2209_s17 = smov (%p48_p7, %s46_s17), 0  ;;  %p66_p10 = scmp.ne.s32.totalorder %s1728_s25, %s1724_s24 }
  0x23   : > { %2186 = sst [smem:[#allocation16_spill]] %s2209_s17  ;;  %s50_s1 = ssub.s32 %s1740_s28, %s2209_s17 }
  0x24   : > { %s2187_s22 = sadd.s32 4294967295, %s1744_s29   ;;  %p51_p12 = scmp.eq.s32.totalorder %s50_s1, 0 }
  0x25   : > { %p428_p11 = scmp.eq.s32.totalorder %s2187_s22, 1  ;;  %p1917_p13 = por %p1881_p1, %p66_p10 }
  0x26   : > { %p434_p2 = scmp.eq.s32.totalorder %s1397_s15, 1  ;;  %p62_p4 = por %p61_p9, %p60_p8 }
  0x27   : > { %p1921_p0 = por %p428_p11, %p60_p8  ;;  %s524_s19 = sand.u32 1, %s1732_s26  }
  0x28   : > { %s1926_s0 = scalar_select %p51_p12, %s1732_s26, %s53_s23  }
  0x29   : > { %p1928_p5 = por %p434_p2, %p66_p10  ;;  %s1403_s21 = sshll.u32 %s1740_s28, 3 }
  0x2a   : > { %p1461_p7 = scmp.lt.s32.totalorder %s1744_s29, 2  ;;  %s1402_s1 = sshll.u32 %s524_s19, 3 }
  0x2b   : > { %s2191_s17 = sld [smem:[#allocation17_spill]]  ;;  %s528_s14 = scalar_lea.vmem [#allocation4], %s1402_s1 }
  0x2c   : > { %s536_s12 = sshll.u32 %s528_s14, 4  ;;  %p1452_p11 = pnand %p1461_p7, %p62_p4  ;;  %s537_s12 = int_to_ptr.vmem [resolvable:$true] %s536_s12 }
  0x2d   : > { %s525_s15 = scalar_lea.sflag [#allocation5], %s524_s19  ;;  %s1941_s23 = sand.u32 (!%p1889_p3), 1, %s1728_s25  }
  0x2e   : > { %s1405_s11 = sshll.u32 (!%p1889_p3), %s1941_s23, 3 }
  0x2f   : > { %545 = sbr.rel (%p1889_p3) target bundleno = 1816 (0x718), region = 88 }
  0x31   : > { %s532_s24 = scalar_lea.hbm %s2191_s17, %s1403_s21  ;;  %s548_s17 = scalar_lea.sflag (!%p1889_p3), [#allocation5], %s1941_s23 }
  0x32   : > { %s534_s27 = sshll.u32 %s532_s24, 4  ;;  %s551_s24 = scalar_lea.vmem (!%p1889_p3), [#allocation4], %s1405_s11  ;;  %s535_s27 = int_to_ptr.hbm [resolvable:$true] %s534_s27 }
  0x33   : > { %1454 = dma.hbm_to_vmem [thread:$0]  (!%p1452_p11), %s535_s27, 128, %s537_s12, %s525_s15  }
  0x34   : > { %1711 = dma.done.wait (%p1917_p13), %s548_s17, 128  }
  0x35   : > { %1713 = vsyncadd (%p1917_p13), %s548_s17, 4294967168 }
  0x36   : > { %1715 = dma.done.wait (%p1881_p1), [#allocation8], 1024  }
  0x37   : > { %1717 = vsyncadd (%p1881_p1), [#allocation8], 4294966272  ;;  %s2192_s3 = sld [smem:[#allocation20_spill]]  ;;  %v1979_v8 = vld [vmem:[%s551_s24] sm:$0xff]  ;;  %vm626_vm0 = vcmask 261120   ;;  %v653_v9 = vld [vmem:[%s2151_s5 + $0x18] sm:$0xff] }
  0x38   : > { %s2193_s19 = sld [smem:[#allocation18_spill]]  ;;  %v652_v10 = vld [vmem:[%s2151_s5 + $0x10] sm:$0xff]  ;;  %v651_v11 = vld [vmem:[%s2151_s5 + $0x8] sm:$0xff]  ;;  %v650_v12 = vld [vmem:[%s2151_s5] sm:$0xff]  ;;  %vm688_vm1 = vcmask 64512   ;;  %s1750_s20 = smov 112  }
  0x39   : > { %v1524_v13 = vld [vmem:[%s2150_s4] ss:$0 sm:$0xff]  ;;  %s1751_s21 = smov 120   ;;  %s2194_s2 = sld [smem:[#allocation19_spill]] }
  0x3a   : > { %s1752_s22 = smov 104   ;;  %v1526_v20 = vld [vmem:[%s2152_s6] ss:$0 sm:$0xff]  ;;  %s1753_s15 = smov 8  }
  0x3b   : > { %s1754_s17 = smov 16   ;;  %s1755_s12 = smov 24  }
  0x3c   : > { %s2197_s1 = sld [smem:[#allocation15_spill]] }
  0x3d   : > { %v621_v0 = vld [vmem:[%s2192_s3 + $0x18] sm:$0xff]  ;;  %v620_v2 = vld [vmem:[%s2192_s3 + $0x10] sm:$0xff]  ;;  %v619_v4 = vld [vmem:[%s2192_s3 + $0x8] sm:$0xff]  ;;  %s2198_s24 = sld [smem:[#allocation25_spill]] }
  0x3e   : > { %v713_v1 = vld [vmem:[%s2193_s19 + $0x18] sm:$0xff]  ;;  %642 = vmatpush.msra.mxu1 %v621_v0  ;;  %v712_v3 = vld [vmem:[%s2193_s19 + $0x10] sm:$0xff]  ;;  %v711_v5 = vld [vmem:[%s2193_s19 + $0x8] sm:$0xff] }
  0x3f   : > { %734 = vmatpush.msra.mxu2 %v713_v1  ;;  %v618_v6 = vld [vmem:[%s2192_s3] sm:$0xff] }
  0x40   : > { %v710_v7 = vld [vmem:[%s2193_s19] sm:$0xff]  ;;  %643 = vmatpush.msra.mxu1 %v620_v2 }
  0x41   : > { %735 = vmatpush.msra.mxu2 %v712_v3  ;;  %v1525_v16 = vld [vmem:[%s2194_s2] ss:$0 sm:$0xff] }
  0x42   : > { %644 = vmatpush.msra.mxu1 %v619_v4  ;;  %s1429_s7 = sshll.u32 %s2197_s1, 3  ;;  %s612_s1 = scalar_lea.vmem [#allocation10], %s1405_s11 }
  0x43   : > { %736 = vmatpush.msra.mxu2 %v711_v5  ;;  %s1293_s2 = sshll.u32 %s612_s1, 4  ;;  %s1294_s2 = int_to_ptr.vmem [resolvable:$true] %s1293_s2 }
  0x44   : > { %645 = vmatpush.msra.mxu1 %v618_v6 }
  0x45   : > { %737 = vmatpush.msra.mxu2 %v710_v7  ;;  %1409 = vmatmul.msk.f32.vlgmr.msra.gmra.mxu1 %vm626_vm0, %v1979_v8 }
  0x46   : > { %1411 = vmatmul.msk.f32.vlgmr.msra.gmra.mxu2 %vm626_vm0, %v1979_v8  ;;  %670 = vmatpush.msrb.mxu1 %v653_v9 }
  0x48   : > { %671 = vmatpush.msrb.mxu1 %v652_v10 }
  0x4a   : > { %672 = vmatpush.msrb.mxu1 %v651_v11 }
  0x4c   : > { %673 = vmatpush.msrb.mxu1 %v650_v12 }
  0x4d   : > { %1410 = vmatmul.msk.f32.vlgmr.msrb.gmra.mxu1 %vm626_vm0, %v1979_v8 }
  0xc2   : > { %v647_v14 = vpop.f32.mrf.mxu1 }
  0xc3   : > { %v648_v15 = vadd.f32 %v1524_v13, %v647_v14 }
  0xc5   : > { %689 = vst.msk [vmem:[#allocation2] sm:$0xff] %vm688_vm1, %v648_v15  ;;  %682 = vrot.lane.b32.xlu1 %v648_v15, %s1750_s20  ;;  %679 = vrot.lane.b32.xlu0 %v648_v15, %s1751_s21 }
  0xc9   : > { %v739_v17 = vpop.f32.mrf.mxu2 }
  0xca   : > { %v740_v18 = vadd.f32 %v1525_v16, %v739_v17  ;;  %v675_v23 = vpop.f32.mrf.mxu1 }
  0xcb   : > { %v676_v24 = vadd.f32 %v1526_v20, %v675_v23 }
  0xcc   : > { %745 = vrot.lane.b32.xlu2 %v740_v18, %s1750_s20  ;;  %v749_v19 = vld [vmem:[#allocation2] sm:$0xff] }
  0xcd   : > { %685 = vrot.lane.b32.xlu1 %v648_v15, %s1752_s22  ;;  %1412 = vmatpush.xpose.msk.msra.mxu3 %vm688_vm1, %v749_v19  ;;  %703 = vst.msk [vmem:[#allocation3] sm:$0xff] %vm688_vm1, %v676_v24 }
  0xce   : > { %743 = vrot.lane.b32.xlu0 %v740_v18, %s1751_s21 }
  0xd0   : > { %1413 = vmatmul.msk.f32.vlgmr.msra.gmra.mxu3 %vm688_vm1, %v740_v18 }
  0xd4   : > { %747 = vrot.lane.b32.xlu2 %v740_v18, %s1752_s22  ;;  %v753_v30 = vld [vmem:[#allocation3] sm:$0xff] }
  0xd5   : > { %694 = vrot.lane.b32.xlu1 %v676_v24, %s1751_s21  ;;  %932 = vmatpush.msrb.mxu2 %v753_v30  ;;  %s2196_s21 = sld [smem:[#allocation24_spill]] }
 0x126   : > { %v746_v27 = vpop.permute.xlu2 %745 }
 0x12e   : > { %v748_v32 = vpop.permute.xlu2 %747 }
 0x137   : > { %v683_v21 = vpop.permute.xlu1 %682  ;;  %v680_v22 = vpop.permute.xlu0 %679 }
 0x138   : > { %691 = vst.msk [vmem:[#allocation2 + $0x10] sm:$0xff] %vm688_vm1, %v683_v21 }
 0x139   : > { %690 = vst.msk [vmem:[#allocation2 + $0x8] sm:$0xff] %vm688_vm1, %v680_v22 }
 0x13f   : > { %v686_v25 = vpop.permute.xlu1 %685  ;;  %v751_v26 = vld [vmem:[#allocation2 + $0x10] sm:$0xff] }
 0x140   : > { %692 = vst.msk [vmem:[#allocation2 + $0x18] sm:$0xff] %vm688_vm1, %v686_v25  ;;  %v750_v28 = vld [vmem:[#allocation2 + $0x8] sm:$0xff]  ;;  %1416 = vmatpush.xpose.msk.msra.mxu0 %vm688_vm1, %v751_v26  ;;  %v744_v29 = vpop.permute.xlu0 %743 }
 0x141   : > { %1414 = vmatpush.xpose.msk.msrb.mxu3 %vm688_vm1, %v750_v28 }
 0x143   : > { %1417 = vmatmul.msk.f32.vlgmr.msra.gmra.mxu0 %vm688_vm1, %v746_v27 }
 0x144   : > { %1415 = vmatmul.msk.f32.vlgmr.msrb.gmra.mxu3 %vm688_vm1, %v744_v29 }
 0x147   : > { %v752_v31 = vld [vmem:[#allocation2 + $0x18] sm:$0xff]  ;;  %v695_v33 = vpop.permute.xlu1 %694 }
 0x148   : > { %1418 = vmatpush.xpose.msk.msra.mxu1 %vm688_vm1, %v752_v31  ;;  %704 = vst.msk [vmem:[#allocation3 + $0x8] sm:$0xff] %vm688_vm1, %v695_v33 }
 0x14b   : > { %1419 = vmatmul.msk.f32.vlgmr.msra.gmra.mxu1 %vm688_vm1, %v748_v32 }
 0x14f   : > { %v754_v37 = vld [vmem:[#allocation3 + $0x8] sm:$0xff] }
 0x150   : > { %955 = vmatpush.msra.mxu3 %v754_v37 }
 0x153   : > { %v780_v34 = vpop.f32.mrf.mxu3 }
 0x154   : > { %v858_v42 = vsel %vm688_vm1, %v780_v34, -inf }
 0x1c0   : > { %v830_v35 = vpop.f32.mrf.mxu0 }
 0x1c1   : > { %v864_v36 = vsel %vm688_vm1, %v830_v35, -inf }
 0x1c2   : > { %865 = vmax.xlane.f32.xlu2 %v864_v36 }
 0x1c7   : > { %v805_v38 = vpop.f32.mrf.mxu3 }
 0x1c8   : > { %v855_v39 = vpop.f32.mrf.mxu1  ;;  %v861_v40 = vsel %vm688_vm1, %v805_v38, -inf }
 0x1c9   : > { %862 = vmax.xlane.f32.xlu0 %v861_v40  ;;  %v867_v41 = vsel %vm688_vm1, %v855_v39, -inf }
 0x1ca   : > { %868 = vmax.xlane.f32.xlu1 %v867_v41 }
 0x1d2   : > { %859 = vmax.xlane.f32.xlu1 %v858_v42 }
 0x1da   : > { %697 = vrot.lane.b32.xlu2 %v676_v24, %s1750_s20 }
 0x1dd   : > { %700 = vrot.lane.b32.xlu0 %v676_v24, %s1752_s22  ;;  %s2195_s22 = sld [smem:[#allocation23_spill]] }
 0x235   : > { %v866_v43 = vpop.xlane.xlu2 %865 }
 0x236   : > { %v884_v44 = vsub.f32 %v830_v35, %v866_v43  ;;  %v872_v3 = vsub.f32 -inf, %v866_v43 }
 0x238   : > { %v890_v45 = vmul.f32 1.442695, %v884_v44  ;;  %v878_v4 = vmul.f32 1.442695, %v872_v3  ;;  %v1090_v3 = vld [vmem:[#allocation7 + $0x18] sm:$0xff] }
 0x239   : > { %1110 = vmatpush.msra.mxu2 %v1090_v3  ;;  %v1212_v3 = vld [vmem:[%s2159_s13 + $0x18] sm:$0xff] }
 0x23a   : > { %1534 = vpow2.f32 %v890_v45 }
 0x23c   : > { %v863_v46 = vpop.xlane.xlu0 %862 }
 0x23d   : > { %v883_v47 = vsub.f32 %v805_v38, %v863_v46  ;;  %v698_v48 = vpop.permute.xlu2 %697  ;;  %v869_v49 = vpop.xlane.xlu1 %868  ;;  %v871_v5 = vsub.f32 -inf, %v863_v46 }
 0x23e   : > { %705 = vst.msk [vmem:[#allocation3 + $0x10] sm:$0xff] %vm688_vm1, %v698_v48  ;;  %v885_v50 = vsub.f32 %v855_v39, %v869_v49  ;;  %v873_v6 = vsub.f32 -inf, %v869_v49 }
 0x23f   : > { %v888_v51 = vmul.f32 1.442695, %v883_v47  ;;  %v876_v7 = vmul.f32 1.442695, %v871_v5 }
 0x240   : > { %v892_v52 = vmul.f32 1.442695, %v885_v50  ;;  %v1535_v53 = vpop.eup %1534  ;;  %v880_v9 = vmul.f32 1.442695, %v873_v6  ;;  %v1088_v6 = vld [vmem:[#allocation7 + $0x8] sm:$0xff] }
 0x241   : > { %1536 = vpow2.f32 %v888_v51  ;;  %v904_v54 = vsel %vm688_vm1, %v1535_v53, 0.0 }
 0x242   : > { %905 = vadd.xlane.f32.xlu0 %v904_v54  ;;  %1538 = vpow2.f32 %v892_v52 }
 0x245   : > { %v2034_v55 = vpop.xlane.xlu1 %859  ;;  %v755_v56 = vld [vmem:[#allocation3 + $0x10] sm:$0xff] }
 0x246   : > { %v882_v57 = vsub.f32 %v780_v34, %v2034_v55  ;;  %978 = vmatpush.msrb.mxu0 %v755_v56 }
 0x247   : > { %1422 = vmatmul.msk.f32.vlgmr.msrb.gmra.mxu0 %vm688_vm1, %v1535_v53  ;;  %v1537_v58 = vpop.eup %1536 }
 0x248   : > { %v886_v59 = vmul.f32 1.442695, %v882_v57  ;;  %1421 = vmatmul.msk.f32.vlgmr.msra.gmra.mxu3 %vm688_vm1, %v1537_v58  ;;  %v901_v60 = vsel %vm688_vm1, %v1537_v58, 0.0  ;;  %v1539_v61 = vpop.eup %1538 }
 0x249   : > { %902 = vadd.xlane.f32.xlu1 %v901_v60  ;;  %v907_v62 = vsel %vm688_vm1, %v1539_v61, 0.0 }
 0x24a   : > { %1540 = vpow2.f32 %v886_v59  ;;  %908 = vadd.xlane.f32.xlu2 %v907_v62  ;;  %v870_v62 = vsub.f32 -inf, %v2034_v55 }
 0x24b   : > { %1542 = vpow2.f32 %v878_v4  ;;  %v1089_v4 = vld [vmem:[#allocation7 + $0x10] sm:$0xff] }
 0x24c   : > { %1544 = vpow2.f32 %v876_v7  ;;  %1111 = vmatpush.msra.mxu2 %v1089_v4  ;;  %v1087_v7 = vld [vmem:[#allocation7] sm:$0xff]  ;;  %v1530_v4 = vld [vmem:[%s2195_s22] ss:$0 sm:$0xff]  ;;  %s1280_s22 = scalar_lea.sflag [#allocation6], %s1941_s23 }
 0x24d   : > { %1546 = vpow2.f32 %v880_v9 }
 0x24e   : > { %1112 = vmatpush.msra.mxu2 %v1088_v6  ;;  %v1210_v6 = vld [vmem:[%s2159_s13 + $0x8] sm:$0xff] }
 0x24f   : > { %v701_v63 = vpop.permute.xlu0 %700 }
 0x250   : > { %706 = vst.msk [vmem:[#allocation3 + $0x18] sm:$0xff] %vm688_vm1, %v701_v63  ;;  %v1541_v0 = vpop.eup %1540  ;;  %v874_v63 = vmul.f32 1.442695, %v870_v62  ;;  %1113 = vmatpush.msra.mxu2 %v1087_v7  ;;  %v1209_v7 = vld [vmem:[%s2159_s13] sm:$0xff] }
 0x251   : > { %1420 = vmatmul.msk.f32.vlgmr.msrb.gmra.mxu2 %vm688_vm1, %v1541_v0  ;;  %v898_v1 = vsel %vm688_vm1, %v1541_v0, 0.0  ;;  %v1543_v10 = vpop.eup %1542 }
 0x252   : > { %899 = vadd.xlane.f32.xlu1 %v898_v1  ;;  %v896_v11 = vmul.f32 0.0, %v1543_v10  ;;  %v1545_v14 = vpop.eup %1544 }
 0x253   : > { %v1547_v15 = vpop.eup %1546  ;;  %v895_v16 = vmul.f32 0.0, %v1545_v14 }
 0x254   : > { %v897_v19 = vmul.f32 0.0, %v1547_v15 }
 0x257   : > { %v756_v2 = vld [vmem:[#allocation3 + $0x18] sm:$0xff] }
 0x258   : > { %1001 = vmatpush.msrb.mxu1 %v756_v2 }
 0x259   : > { %1423 = vmatmul.msk.f32.vlgmr.msrb.gmra.mxu1 %vm688_vm1, %v1539_v61 }
 0x2b5   : > { %v906_v12 = vpop.xlane.xlu0 %905 }
 0x2b6   : > { %v912_v13 = vadd.f32 %v906_v12, %v896_v11 }
 0x2b8   : > { %1548 = vrcp.f32 %v912_v13  ;;  %vm1043_vm7 = vweird.f32 %v912_v13  ;;  %v1049_v42 = vand.u32 2147483648, %v912_v13  ;;  %v1047_v44 = vand.u32 2147483647, %v912_v13 }
 0x2ba   : > { %v1050_v51 = vor.u32 1.1754944e-38, %v1049_v42  ;;  %vm1048_vm12 = vcmp.eq.f32.partialorder %v1047_v44, 8.507059e+37  ;;  %v1160_v44 = vld [vmem:[#allocation9 + $0x10] sm:$0xff] }
 0x2bc   : > { %v903_v17 = vpop.xlane.xlu1 %902 }
 0x2bd   : > { %v911_v18 = vadd.f32 %v903_v17, %v895_v16  ;;  %v909_v20 = vpop.xlane.xlu2 %908 }
 0x2be   : > { %v1549_v21 = vpop.eup %1548  ;;  %v913_v22 = vadd.f32 %v909_v20, %v897_v19 }
 0x2bf   : > { %1550 = vrcp.f32 %v911_v18  ;;  %v1039_v23 = vmul.f32 %v1549_v21, %v912_v13  ;;  %v1033_v30 = vand.u32 2147483647, %v911_v18  ;;  %v1035_v31 = vand.u32 2147483648, %v911_v18 }
 0x2c0   : > { %1552 = vrcp.f32 %v913_v22  ;;  %vm1029_vm3 = vweird.f32 %v911_v18  ;;  %vm1044_vm4 = vweird.f32 %v1549_v21  ;;  %v1063_v47 = vand.u32 2147483648, %v913_v22 }
 0x2c1   : > { %v1040_v25 = vsub.f32 1.0, %v1039_v23  ;;  %v1036_v38 = vor.u32 1.1754944e-38, %v1035_v31  ;;  %vm1034_vm6 = vcmp.eq.f32.partialorder %v1033_v30, 8.507059e+37  ;;  %vm1045_vm9 = vmor %vm1043_vm7, %vm1044_vm4  ;;  %vm1057_vm10 = vweird.f32 %v913_v22 }
 0x2c2   : > { %v1061_v49 = vand.u32 2147483647, %v913_v22  ;;  %v1064_v56 = vor.u32 1.1754944e-38, %v1063_v47  ;;  %1554 = vpow2.f32 %v874_v63  ;;  %vm1083_vm4 = vcmask 130048   ;;  %v1216_v63 = vld [vmem:[%s2159_s13 + $0x38] sm:$0xff] }
 0x2c3   : > { %v1041_v33 = vmul.f32 %v1549_v21, %v1040_v25  ;;  %1233 = vmatpush.msra.mxu0 %v1216_v63 }
 0x2c4   : > { %v980_v50 = vpop.f32.mrf.mxu0  ;;  %vm1062_vm13 = vcmp.eq.f32.partialorder %v1061_v49, 8.507059e+37 }
 0x2c5   : > { %v1551_v24 = vpop.eup %1550  ;;  %v1042_v39 = vadd.f32 %v1549_v21, %v1041_v33  ;;  %v1008_v57 = vadd.f32 %v980_v50, %v896_v11  ;;  %v900_v1 = vpop.xlane.xlu1 %899 }
 0x2c6   : > { %v1025_v26 = vmul.f32 %v1551_v24, %v911_v18  ;;  %v1553_v27 = vpop.eup %1552  ;;  %vm1030_vm2 = vweird.f32 %v1551_v24 }
 0x2c7   : > { %v1053_v29 = vmul.f32 %v1553_v27, %v913_v22  ;;  %vm1031_vm5 = vmor %vm1029_vm3, %vm1030_vm2  ;;  %vm1058_vm8 = vweird.f32 %v1553_v27  ;;  %v1046_v48 = vsel %vm1045_vm9, %v1549_v21, %v1042_v39 }
 0x2c8   : > { %v1026_v28 = vsub.f32 1.0, %v1025_v26  ;;  %vm1059_vm11 = vmor %vm1057_vm10, %vm1058_vm8  ;;  %v1051_v53 = vsel %vm1048_vm12, %v1050_v51, %v1046_v48  ;;  %v1555_v0 = vpop.eup %1554 }
 0x2c9   : > { %v1054_v32 = vsub.f32 1.0, %v1053_v29  ;;  %v1068_v60 = vmul.f32 %v1051_v53, %v1008_v57  ;;  %v894_v2 = vmul.f32 0.0, %v1555_v0  ;;  %v1528_v57 = vld [vmem:[%s2155_s9] ss:$0 sm:$0xff]  ;;  %v1215_v0 = vld [vmem:[%s2159_s13 + $0x30] sm:$0xff] }
 0x2ca   : > { %v1027_v34 = vmul.f32 %v1551_v24, %v1026_v28  ;;  %1234 = vmatpush.msra.mxu0 %v1215_v0 }
 0x2cb   : > { %v957_v35 = vpop.f32.mrf.mxu3  ;;  %v1055_v37 = vmul.f32 %v1553_v27, %v1054_v32  ;;  %v910_v5 = vadd.f32 %v900_v1, %v894_v2  ;;  %v1756_v32 = vmov 32.0   ;;  %v1214_v1 = vld [vmem:[%s2159_s13 + $0x28] sm:$0xff] }
 0x2cc   : > { %v1028_v36 = vadd.f32 %v1551_v24, %v1027_v34  ;;  %v1007_v40 = vadd.f32 %v957_v35, %v895_v16  ;;  %1235 = vmatpush.msra.mxu0 %v1214_v1 }
 0x2cd   : > { %v1056_v46 = vadd.f32 %v1553_v27, %v1055_v37  ;;  %1556 = vrcp.f32 %v910_v5  ;;  %v1021_v13 = vand.u32 2147483648, %v910_v5  ;;  %vm1015_vm15 = vweird.f32 %v910_v5 }
 0x2ce   : > { %v1032_v41 = vsel %vm1031_vm5, %v1551_v24, %v1028_v36  ;;  %v1019_v14 = vand.u32 2147483647, %v910_v5  ;;  %vm1085_vm5 = vcmask 195584   ;;  %1558 = vrcp.f32 %v1756_v32 }
 0x2cf   : > { %v1037_v43 = vsel %vm1034_vm6, %v1036_v38, %v1032_v41  ;;  %v1060_v52 = vsel %vm1059_vm11, %v1553_v27, %v1056_v46  ;;  %v1022_v18 = vor.u32 1.1754944e-38, %v1021_v13  ;;  %v1527_v27 = vld [vmem:[%s2154_s8] ss:$0 sm:$0xff]  ;;  %v1158_v46 = vld [vmem:[#allocation9] sm:$0xff] }
 0x2d0   : > { %v1067_v45 = vmul.f32 %v1037_v43, %v1007_v40  ;;  %v1065_v59 = vsel %vm1062_vm13, %v1064_v56, %v1060_v52  ;;  %vm1020_vm3 = vcmp.eq.f32.partialorder %v1019_v14, 8.507059e+37  ;;  %v1161_v43 = vld [vmem:[#allocation9 + $0x18] sm:$0xff]  ;;  %vm1221_vm13 = vcmask 523264  }
 0x2d1   : > { %1181 = vmatpush.msrb.mxu3 %v1161_v43  ;;  %v1532_v43 = vld [vmem:[%s2198_s24] ss:$0 sm:$0xff] }
 0x2d2   : > { %1071 = vrot.lane.b32.xlu1 %v1067_v45, %s1753_s15  ;;  %v1159_v45 = vld [vmem:[#allocation9 + $0x8] sm:$0xff] }
 0x2d3   : > { %v1557_v9 = vpop.eup %1556  ;;  %1182 = vmatpush.msrb.mxu3 %v1160_v44 }
 0x2d4   : > { %v1011_v10 = vmul.f32 %v1557_v9, %v910_v5  ;;  %vm1016_vm14 = vweird.f32 %v1557_v9  ;;  %v934_v17 = vpop.f32.mrf.mxu2  ;;  %v1559_v33 = vpop.eup %1558  ;;  %v1211_v5 = vld [vmem:[%s2159_s13 + $0x10] sm:$0xff] }
 0x2d5   : > { %vm1017_vm2 = vmor %vm1015_vm15, %vm1016_vm14  ;;  %v1006_v20 = vadd.f32 %v934_v17, %v894_v2  ;;  %v1123_v34 = vmul.f32 32.0, %v1559_v33  ;;  %1183 = vmatpush.msrb.mxu3 %v1159_v45  ;;  %v1213_v2 = vld [vmem:[%s2159_s13 + $0x20] sm:$0xff] }
 0x2d6   : > { %v1003_v54 = vpop.f32.mrf.mxu1  ;;  %v1012_v11 = vsub.f32 1.0, %v1011_v10  ;;  %1236 = vmatpush.msra.mxu0 %v1213_v2 }
 0x2d7   : > { %v1009_v58 = vadd.f32 %v1003_v54, %v897_v19  ;;  %v1124_v35 = vsub.f32 1.0, %v1123_v34  ;;  %1184 = vmatpush.msrb.mxu3 %v1158_v46 }
 0x2d8   : > { %v1013_v12 = vmul.f32 %v1557_v9, %v1012_v11  ;;  %1237 = vmatpush.msra.mxu0 %v1212_v3 }
 0x2d9   : > { %v1069_v61 = vmul.f32 %v1065_v59, %v1009_v58  ;;  %v1125_v36 = vmul.f32 %v1559_v33, %v1124_v35 }
 0x2da   : > { %1075 = vrot.lane.b32.xlu1 %v1068_v60, %s1754_s17  ;;  %v1014_v55 = vadd.f32 %v1557_v9, %v1013_v12  ;;  %v1529_v60 = vld [vmem:[%s2156_s10] ss:$0 sm:$0xff]  ;;  %1238 = vmatpush.msra.mxu0 %v1211_v5 }
 0x2db   : > { %1079 = vrot.lane.b32.xlu0 %v1069_v61, %s1755_s12  ;;  %v1126_v37 = vadd.f32 %v1559_v33, %v1125_v36  ;;  %s2199_s12 = sld [smem:[#allocation27_spill]] }
 0x2dc   : > { %v1018_v15 = vsel %vm1017_vm2, %v1557_v9, %v1014_v55  ;;  %1239 = vmatpush.msra.mxu0 %v1210_v6 }
 0x2dd   : > { %v1023_v19 = vsel %vm1020_vm3, %v1022_v18, %v1018_v15 }
 0x2de   : > { %v1066_v21 = vmul.f32 %v1023_v19, %v1006_v20  ;;  %1240 = vmatpush.msra.mxu0 %v1209_v7 }
 0x2e1   : > { %s1291_s14 = scalar_lea.hbm %s2199_s12, %s1429_s7  ;;  %s1678_s11 = scalar_lea.hbm %s2199_s12, 16 }
 0x2e2   : > { %s1295_s3 = sshll.u32 %s1291_s14, 4  ;;  %s1296_s3 = int_to_ptr.hbm [resolvable:$true] %s1295_s3 }
 0x2e3   : > { %s1672_s30 = sshra.s32 %s1296_s3, 4  ;;  %s1673_s30 = int_to_ptr.hbm [resolvable:$true] %s1672_s30 }
 0x2e4   : > { %s1674_s7 = scalar_lea.hbm %s1673_s30, 8  ;;  %p1679_p9 = scmp.lt.s32.totalorder %s1673_s30, %s2199_s12 }
 0x2e5   : > { %p1675_p1 = scmp.ne.s32.totalorder %s1673_s30, %s1674_s7  ;;  %p1680_p10 = scmp.lt.s32.totalorder %s1678_s11, %s1674_s7 }
 0x2e7   : > { %p1676_p3 = pnand %p1675_p1, %p1921_p0  ;;  %p1681_p12 = por %p1680_p10, %p1679_p9 }
 0x2e9   : > { %p1677_p8 = pneg %p1676_p3 }
 0x2eb   : > { %p1682_p13 = pnand %p1681_p12, %p1677_p8 }
 0x344   : > { %v1072_v16 = vpop.permute.xlu1 %1071 }
 0x345   : > { %v1082_v22 = vsel %vm688_vm1, %v1066_v21, %v1072_v16  ;;  %vm1127_vm1 = vweird.f32 %v1559_v33 }
 0x346   : > { %v2053_v38 = vsel %vm1127_vm1, %v1559_v33, %v1126_v37 }
 0x34c   : > { %v1076_v23 = vpop.permute.xlu1 %1075 }
 0x34d   : > { %v1080_v24 = vpop.permute.xlu0 %1079  ;;  %v1084_v25 = vsel %vm1083_vm4, %v1082_v22, %v1076_v23 }
 0x34e   : > { %v1086_v26 = vsel %vm1085_vm5, %v1084_v25, %v1080_v24  ;;  %v1531_v24 = vld [vmem:[%s2196_s21] ss:$0 sm:$0xff]  ;;  %s2200_s21 = sld [smem:[#allocation26_spill]] }
 0x34f   : > { %1424 = vmatmul.msk.f32.vlgmr.msra.gmra.mxu2 %vm626_vm0, %v1086_v26 }
 0x354   : > { %v1533_v45 = vld [vmem:[%s2200_s21] ss:$0 sm:$0xff] }
 0x3d2   : > { %v1115_v28 = vpop.f32.mrf.mxu2 }
 0x3d3   : > { %v1116_v29 = vadd.f32 %v1527_v27, %v1115_v28 }
 0x3d5   : > { %v1118_v30 = vadd.f32 %v1116_v29, %v1979_v8 }
 0x3d7   : > { %v1119_v31 = vsel %vm626_vm0, %v1118_v30, 0.0 }
 0x3d8   : > { %1120 = vadd.xlane.f32.xlu2 %v1119_v31 }
 0x44b   : > { %v1121_v39 = vpop.xlane.xlu2 %1120 }
 0x44c   : > { %v1129_v40 = vmul.f32 %v2053_v38, %v1121_v39 }
 0x44e   : > { %v1130_v41 = vsub.f32 %v1118_v30, %v1129_v40 }
 0x450   : > { %v1131_v42 = vmul.f32 %v1130_v41, %v1130_v41 }
 0x452   : > { %v1132_v8 = vsel %vm626_vm0, %v1131_v42, 0.0 }
 0x453   : > { %1133 = vadd.xlane.f32.xlu1 %v1132_v8 }
 0x4c6   : > { %v1134_v47 = vpop.xlane.xlu1 %1133 }
 0x4c7   : > { %v1135_v48 = vmul.f32 %v1134_v47, %v2053_v38 }
 0x4c9   : > { %v1136_v49 = vadd.f32 1e-05, %v1135_v48 }
 0x4cb   : > { %1560 = vrsqrt.f32 %v1136_v49  ;;  %vm1143_vm7 = vweird.f32 %v1136_v49 }
 0x4d1   : > { %v1561_v50 = vpop.eup %1560 }
 0x4d2   : > { %v1138_v51 = vmul.f32 %v1561_v50, %v1136_v49  ;;  %vm1144_vm6 = vweird.f32 %v1561_v50 }
 0x4d3   : > { %vm1145_vm8 = vmor %vm1143_vm7, %vm1144_vm6 }
 0x4d4   : > { %v1139_v52 = vmul.f32 %v1561_v50, %v1138_v51 }
 0x4d6   : > { %v1140_v53 = vmul.f32 0.5, %v1139_v52 }
 0x4d8   : > { %v1141_v54 = vsub.f32 1.5, %v1140_v53 }
 0x4da   : > { %v1142_v56 = vmul.f32 %v1561_v50, %v1141_v54 }
 0x4dc   : > { %v1146_v58 = vsel %vm1145_vm8, %v1561_v50, %v1142_v56 }
 0x4dd   : > { %v1147_v59 = vmul.f32 %v1146_v58, %v1130_v41 }
 0x4df   : > { %v1152_v61 = vmul.f32 %v1528_v57, %v1147_v59 }
 0x4e1   : > { %v1157_v62 = vadd.f32 %v1529_v60, %v1152_v61 }
 0x4e3   : > { %1425 = vmatmul.msk.f32.vlgmr.msrb.gmra.mxu3 %vm626_vm0, %v1157_v62 }
 0x566   : > { %v1186_v9 = vpop.f32.mrf.mxu3 }
 0x567   : > { %v1187_v10 = vadd.f32 %v1530_v4, %v1186_v9 }
 0x569   : > { %v1426_v11 = vmul.f32 -1.442695, %v1187_v10 }
 0x56b   : > { %1562 = vpow2.f32 %v1426_v11 }
 0x571   : > { %v1563_v12 = vpop.eup %1562 }
 0x572   : > { %v1192_v55 = vadd.f32 1.0, %v1563_v12 }
 0x574   : > { %1564 = vrcp.f32 %v1192_v55  ;;  %v1204_v16 = vand.u32 2147483648, %v1192_v55  ;;  %v1202_v18 = vand.u32 2147483647, %v1192_v55  ;;  %vm1198_vm10 = vweird.f32 %v1192_v55 }
 0x576   : > { %v1205_v20 = vor.u32 1.1754944e-38, %v1204_v16  ;;  %vm1203_vm12 = vcmp.eq.f32.partialorder %v1202_v18, 8.507059e+37 }
 0x57a   : > { %v1565_v13 = vpop.eup %1564 }
 0x57b   : > { %v1194_v14 = vmul.f32 %v1565_v13, %v1192_v55  ;;  %vm1199_vm9 = vweird.f32 %v1565_v13 }
 0x57c   : > { %vm1200_vm11 = vmor %vm1198_vm10, %vm1199_vm9 }
 0x57d   : > { %v1195_v15 = vsub.f32 1.0, %v1194_v14 }
 0x57f   : > { %v1196_v17 = vmul.f32 %v1565_v13, %v1195_v15 }
 0x581   : > { %v1197_v19 = vadd.f32 %v1565_v13, %v1196_v17 }
 0x583   : > { %v1201_v21 = vsel %vm1200_vm11, %v1565_v13, %v1197_v19 }
 0x584   : > { %v1206_v22 = vsel %vm1203_vm12, %v1205_v20, %v1201_v21 }
 0x585   : > { %v1208_v23 = vmul.f32 %v1206_v22, %v1187_v10 }
 0x587   : > { %1427 = vmatmul.msk.f32.vlgmr.msra.gmra.mxu0 %vm1221_vm13, %v1208_v23 }
 0x604   : > { %v1242_v25 = vpop.f32.mrf.mxu0 }
 0x605   : > { %v1243_v26 = vadd.f32 %v1531_v24, %v1242_v25 }
 0x607   : > { %v1245_v27 = vadd.f32 %v1243_v26, %v1157_v62 }
 0x609   : > { %v1246_v28 = vsel %vm626_vm0, %v1245_v27, 0.0 }
 0x60a   : > { %1247 = vadd.xlane.f32.xlu2 %v1246_v28 }
 0x67d   : > { %v1248_v29 = vpop.xlane.xlu2 %1247 }
 0x67e   : > { %v1249_v30 = vmul.f32 %v1248_v29, %v2053_v38 }
 0x680   : > { %v1250_v31 = vsub.f32 %v1245_v27, %v1249_v30 }
 0x682   : > { %v1251_v32 = vmul.f32 %v1250_v31, %v1250_v31 }
 0x684   : > { %v1252_v33 = vsel %vm626_vm0, %v1251_v32, 0.0 }
 0x685   : > { %1253 = vadd.xlane.f32.xlu2 %v1252_v33 }
 0x6f8   : > { %v1254_v34 = vpop.xlane.xlu2 %1253 }
 0x6f9   : > { %v1255_v35 = vmul.f32 %v1254_v34, %v2053_v38 }
 0x6fb   : > { %v1256_v36 = vadd.f32 1e-05, %v1255_v35 }
 0x6fd   : > { %1566 = vrsqrt.f32 %v1256_v36  ;;  %vm1263_vm15 = vweird.f32 %v1256_v36 }
 0x703   : > { %v1567_v37 = vpop.eup %1566 }
 0x704   : > { %v1258_v39 = vmul.f32 %v1567_v37, %v1256_v36  ;;  %vm1264_vm14 = vweird.f32 %v1567_v37 }
 0x705   : > { %vm1265_vm2 = vmor %vm1263_vm15, %vm1264_vm14 }
 0x706   : > { %v1259_v40 = vmul.f32 %v1567_v37, %v1258_v39 }
 0x708   : > { %v1260_v41 = vmul.f32 0.5, %v1259_v40 }
 0x70a   : > { %v1261_v42 = vsub.f32 1.5, %v1260_v41 }
 0x70c   : > { %v1262_v8 = vmul.f32 %v1567_v37, %v1261_v42 }
 0x70e   : > { %v1266_v38 = vsel %vm1265_vm2, %v1567_v37, %v1262_v8 }
 0x70f   : > { %v1267_v44 = vmul.f32 %v1266_v38, %v1250_v31 }
 0x711   : > { %v1272_v46 = vmul.f32 %v1532_v43, %v1267_v44 }
 0x713   : > { %v1277_v47 = vadd.f32 %v1533_v45, %v1272_v46 }
 0x715   : > { %1278 = vst.msk [vmem:[%s612_s1] sm:$0xff] %vm626_vm0, %v1277_v47 }
 0x716   : > { %1685 = shalt.err (!%p1682_p13)
}
 0x717   : > { %1442 = dma.vmem_to_hbm [thread:$0]  (%p1921_p0), %s1294_s2, 128, %s1296_s3, %s1280_s22  }
 0x718 PF: > { %s2201_s23 = sld [smem:[#allocation14_spill]]  ;;  %p1456_p2 = pnand %p1401_p6, %p1928_p5 }
 0x71a   : > { %p1457_p4 = pneg %p1456_p2 }
 0x71e   : > { %s1307_s27 = sand.u32 1, %s2201_s23  }
 0x71f   : > { %s1308_s20 = scalar_lea.sflag [#allocation6], %s1307_s27 }
 0x720   : > { %1719 = dma.done.wait (%p1457_p4), %s1308_s20, 128  }
 0x721   : > { %1721 = vsyncadd (%p1457_p4), %s1308_s20, 4294967168  ;;  %s34_s29 = sadd.s32 1, %s1744_s29   ;;  %s2202_s2 = sld [smem:[#allocation16_spill]] }
 0x722   : > { %p31_p7 = scmp.ge.s32.totalorder %s34_s29, 4   ;;  %s2203_s24 = smov %s1728_s25 }
 0x723   : > { %s2204_s25 = smov %s1732_s26  ;;  %s2205_s26 = smov %s1926_s0 }
 0x724   : > { %s2206_s27 = smov %s1740_s28  ;;  %33 = sbr.rel (!%p31_p7) target bundleno = 19 (0x13), region = 146 }
 0x727   : > { %s2207_s28 = smov %s2202_s2 }
 0x729   :  { %1314 = vsyncpa [#allocation5], 1 }
 0x72a   :  { %1316 = vsyncpa [#allocation5 + $0x1], 1 }
 0x72b   :  { %1317 = vsyncpa [#allocation8], 1 }
 0x72c   :  { %1318 = vsyncpa [#allocation6], 1 }
 0x72d   :  { %1320 = vsyncpa [#allocation6 + $0x1], 1 }

</bundles_post_ra>
